<compile_context>
chip_gen: v7x
topology: tpu7x:2x2x1
jax: 0.10.0
libtpu: 0.0.40
codegen_flags: <defaults>
</compile_context>

<pallas_src>
import functools

import jax
import jax.numpy as jnp
from jax import lax
from jax.experimental import pallas as pl
from jax.experimental.pallas import tpu as pltpu

LANE = 128
SUBLANE = 8


def _ru(n, m):
    return ((n + m - 1) // m) * m


def _pad2d(a, rows, cols, dtype=None):
    """Zero-pad 2-D array `a` to (rows, cols), optionally casting."""
    dt = a.dtype if dtype is None else dtype
    out = jnp.zeros((rows, cols), dt)
    r, c = a.shape
    return out.at[:r, :c].set(a.astype(dt))


# ----------------------------------------------------------------------------
# Fused Pallas kernel: entire GraphSAGE forward in one call
# ----------------------------------------------------------------------------

def _graphsage_fused_kernel(
    didx_ref, pidx_ref,                     # [Bp, 1] int32 pair indices
    xd_ref, xp_ref,                         # node features (bf16, padded)
    adj_dp_ref, adj_pd_ref,                 # row-normalized adjacency (bf16)
    dw_ref, db_ref, pw_ref, pb_ref,         # input linears
    wl_dp_ref, bl_dp_ref, wr_dp_ref,        # SAGEConv drug->protein
    wl_pd_ref, bl_pd_ref, wr_pd_ref,        # SAGEConv protein->drug
    fc1wd_ref, fc1wp_ref, fc1b_ref,         # fc1 (concat folded into two halves)
    fc2w_ref, fc2b_ref,                     # fc2 (lane-dense padded output)
    o_ref,                                  # [Bp, 128] f32 output slab
):
    f32 = jnp.float32
    bf16 = jnp.bfloat16

    def mm(a, b):
        return jnp.dot(a, b, preferred_element_type=f32)

    # 1) per-node-type input projections: h = x @ W + b   (bf16 MXU, f32 acc)
    h_drug = mm(xd_ref[...], dw_ref[...]) + db_ref[...]          # [Nd, H] f32
    h_prot = mm(xp_ref[...], pw_ref[...]) + pb_ref[...]          # [Np, H] f32
    hd = h_drug.astype(bf16)
    hp = h_prot.astype(bf16)

    # 2) HeteroConv(aggr='sum'): one SAGEConv per edge type.
    #    out_dst = mean_{j in N(i)} x_src_j @ W_l + b_l + x_dst @ W_r
    # drug -> protein
    agg_p = mm(adj_dp_ref[...], hd).astype(bf16)                 # [Np, H]
    out_prot = (mm(agg_p, wl_dp_ref[...]) + bl_dp_ref[...]
                + mm(hp, wr_dp_ref[...]))                        # [Np, H] f32
    # protein -> drug
    agg_d = mm(adj_pd_ref[...], hp).astype(bf16)                 # [Nd, H]
    out_drug = (mm(agg_d, wl_pd_ref[...]) + bl_pd_ref[...]
                + mm(hd, wr_pd_ref[...]))                        # [Nd, H] f32

    # 3) pair gather in-VMEM via exact one-hot selection matmuls (f32)
    bp = o_ref.shape[0]
    nd = out_drug.shape[0]
    npr = out_prot.shape[0]
    sel_d = (lax.broadcasted_iota(jnp.int32, (bp, nd), 1)
             == didx_ref[...]).astype(f32)                       # [Bp, Nd]
    sel_p = (lax.broadcasted_iota(jnp.int32, (bp, npr), 1)
             == pidx_ref[...]).astype(f32)                       # [Bp, Np]
    drug_emb = mm(sel_d, out_drug)                               # [Bp, H] f32
    prot_emb = mm(sel_p, out_prot)                               # [Bp, H] f32

    # 4) MLP head: ReLU(concat(drug,prot) @ W1 + b1) @ W2 + b2
    #    concat folded into two matmuls against the split fc1 weight.
    h = (mm(drug_emb.astype(bf16), fc1wd_ref[...])
         + mm(prot_emb.astype(bf16), fc1wp_ref[...])
         + fc1b_ref[...])
    h = jnp.maximum(h, 0.0).astype(bf16)
    o_ref[...] = mm(h, fc2w_ref[...]) + fc2b_ref[...]            # [Bp, 128] f32


# ----------------------------------------------------------------------------
# Host-side packing (padding + dtype) and the jitted forward
# ----------------------------------------------------------------------------

def build_mean_adjacency(edge_index, n_src, n_dst):
    """A[dst, src] row-normalized so A @ x_src = mean over neighbors
    (zero rows for isolated destination nodes, matching PyG scatter-mean)."""
    src, dst = edge_index
    a = jnp.zeros((n_dst, n_src), jnp.float32).at[dst, src].add(1.0)
    deg = jnp.sum(a, axis=1, keepdims=True)
    return a / jnp.maximum(deg, 1.0)


def prepare_graph(x_drug, x_protein, adj_d2p, adj_p2d):
    """Pad graph tensors once to lane-dense shapes and cast MXU operands to bf16."""
    n_drug, drug_in = x_drug.shape
    n_prot, prot_in = x_protein.shape
    ndp, npp = _ru(n_drug, LANE), _ru(n_prot, LANE)
    fdp, fpp = _ru(drug_in, LANE), _ru(prot_in, LANE)
    bf = jnp.bfloat16
    return {
        "xd": _pad2d(x_drug, ndp, fdp, bf),
        "xp": _pad2d(x_protein, npp, fpp, bf),
        "adj_dp": _pad2d(adj_d2p, npp, ndp, bf),   # [Np, Nd]
        "adj_pd": _pad2d(adj_p2d, ndp, npp, bf),   # [Nd, Np]
    }


def pack_params(params, hidden):
    """Pad / transpose-layout / bf16-cast parameters into kernel-ready form."""
    hp = _ru(hidden, LANE)
    outp = LANE
    bf, f32 = jnp.bfloat16, jnp.float32
    fdp = _ru(params["drug_lin_w"].shape[0], LANE)
    fpp = _ru(params["protein_lin_w"].shape[0], LANE)
    fc1_w = params["fc1_w"]                      # [2H, H]
    return {
        "dw": _pad2d(params["drug_lin_w"], fdp, hp, bf),
        "db": _pad2d(params["drug_lin_b"], 1, hp, f32),
        "pw": _pad2d(params["protein_lin_w"], fpp, hp, bf),
        "pb": _pad2d(params["protein_lin_b"], 1, hp, f32),
        "wl_dp": _pad2d(params["sage_d2p_wl"], hp, hp, bf),
        "bl_dp": _pad2d(params["sage_d2p_bl"], 1, hp, f32),
        "wr_dp": _pad2d(params["sage_d2p_wr"], hp, hp, bf),
        "wl_pd": _pad2d(params["sage_p2d_wl"], hp, hp, bf),
        "bl_pd": _pad2d(params["sage_p2d_bl"], 1, hp, f32),
        "wr_pd": _pad2d(params["sage_p2d_wr"], hp, hp, bf),
        "fc1w_d": _pad2d(fc1_w[:hidden, :], hp, hp, bf),
        "fc1w_p": _pad2d(fc1_w[hidden:, :], hp, hp, bf),
        "fc1b": _pad2d(params["fc1_b"], 1, hp, f32),
        "fc2w": _pad2d(params["fc2_w"], hp, outp, bf),
        "fc2b": _pad2d(params["fc2_b"], 1, outp, f32),
    }


@jax.jit
def graphsage_forward(graph, packed, drug_idx, protein_idx):
    batch = drug_idx.shape[0]
    bp = _ru(batch, SUBLANE)
    didx = jnp.zeros((bp, 1), jnp.int32).at[:batch, 0].set(drug_idx.astype(jnp.int32))
    pidx = jnp.zeros((bp, 1), jnp.int32).at[:batch, 0].set(protein_idx.astype(jnp.int32))

    inputs = [
        didx, pidx,
        graph["xd"], graph["xp"], graph["adj_dp"], graph["adj_pd"],
        packed["dw"], packed["db"], packed["pw"], packed["pb"],
        packed["wl_dp"], packed["bl_dp"], packed["wr_dp"],
        packed["wl_pd"], packed["bl_pd"], packed["wr_pd"],
        packed["fc1w_d"], packed["fc1w_p"], packed["fc1b"],
        packed["fc2w"], packed["fc2b"],
    ]

    ndp, fdp = graph["xd"].shape
    npp, fpp = graph["xp"].shape
    hp = packed["dw"].shape[1]
    outp = packed["fc2w"].shape[1]

    flops = 2 * (
        ndp * fdp * hp + npp * fpp * hp                     # input linears
        + npp * ndp * hp + 2 * npp * hp * hp                # sage d->p
        + ndp * npp * hp + 2 * ndp * hp * hp                # sage p->d
        + bp * ndp * hp + bp * npp * hp                     # one-hot gathers
        + 2 * bp * hp * hp + bp * hp * outp                 # MLP head
    )
    bytes_accessed = (sum(int(a.size) * a.dtype.itemsize for a in inputs)
                      + bp * outp * 4)

    out = pl.pallas_call(
        _graphsage_fused_kernel,
        out_shape=jax.ShapeDtypeStruct((bp, outp), jnp.float32),
        in_specs=[pl.BlockSpec(memory_space=pltpu.VMEM)] * len(inputs),
        out_specs=pl.BlockSpec(memory_space=pltpu.VMEM),
        cost_estimate=pl.CostEstimate(flops=flops, transcendentals=0,
                                      bytes_accessed=bytes_accessed),
    )(*inputs)

    return out[:batch, 0]   # squeeze(1) + drop padded rows / lane padding


# ----------------------------------------------------------------------------
# Parameter init (shapes implied by __init__; stored as [F_in, F_out])
# ----------------------------------------------------------------------------

def init_params(key, drug_in, protein_in, hidden):
    keys = jax.random.split(key, 14)

    def w(k, fi, fo):
        return jax.random.normal(k, (fi, fo), jnp.float32) / jnp.sqrt(fi)

    def b(k, fo):
        return jax.random.normal(k, (1, fo), jnp.float32) * 0.01

    return {
        "drug_lin_w": w(keys[0], drug_in, hidden), "drug_lin_b": b(keys[1], hidden),
        "protein_lin_w": w(keys[2], protein_in, hidden), "protein_lin_b": b(keys[3], hidden),
        "sage_d2p_wl": w(keys[4], hidden, hidden), "sage_d2p_bl": b(keys[5], hidden),
        "sage_d2p_wr": w(keys[6], hidden, hidden),
        "sage_p2d_wl": w(keys[7], hidden, hidden), "sage_p2d_bl": b(keys[8], hidden),
        "sage_p2d_wr": w(keys[9], hidden, hidden),
        "fc1_w": w(keys[10], 2 * hidden, hidden), "fc1_b": b(keys[11], hidden),
        "fc2_w": w(keys[12], hidden, 1), "fc2_b": b(keys[13], 1),
    }


# Pure-JAX reference (mirrors the kernel's bf16 matmul operands, f32 accum).
def reference_forward(params, x_drug, x_protein, adj_dp, adj_pd,
                      drug_idx, protein_idx):
    bf, f32 = jnp.bfloat16, jnp.float32

    def mm(a, b):
        return jnp.dot(a.astype(bf), b.astype(bf), preferred_element_type=f32)

    h_d = mm(x_drug, params["drug_lin_w"]) + params["drug_lin_b"]
    h_p = mm(x_protein, params["protein_lin_w"]) + params["protein_lin_b"]
    out_p = (mm(mm(adj_dp, h_d), params["sage_d2p_wl"]) + params["sage_d2p_bl"]
             + mm(h_p, params["sage_d2p_wr"]))
    out_d = (mm(mm(adj_pd, h_p), params["sage_p2d_wl"]) + params["sage_p2d_bl"]
             + mm(h_d, params["sage_p2d_wr"]))
    comb = jnp.concatenate([out_d[drug_idx], out_p[protein_idx]], axis=1)
    h = jnp.maximum(mm(comb, params["fc1_w"]) + params["fc1_b"], 0.0)
    return (mm(h, params["fc2_w"]) + params["fc2_b"])[:, 0]


if __name__ == "__main__":
    key = jax.random.PRNGKey(0)
    k_feat_d, k_feat_p, k_edge, k_idx, k_params = jax.random.split(key, 5)

    # small synthetic hetero graph
    n_drug, n_protein = 16, 24
    drug_in, protein_in, hidden = 20, 12, 32
    n_edges, batch = 40, 8

    x_drug = jax.random.normal(k_feat_d, (n_drug, drug_in), jnp.float32)
    x_protein = jax.random.normal(k_feat_p, (n_protein, protein_in), jnp.float32)

    e_src = jax.random.randint(k_edge, (n_edges,), 0, n_drug)
    e_dst = jax.random.randint(jax.random.fold_in(k_edge, 1), (n_edges,), 0, n_protein)
    edge_d2p = jnp.stack([e_src, e_dst])          # drug -> protein
    edge_p2d = jnp.stack([e_dst, e_src])          # protein -> drug (reverse edges)

    adj_d2p = build_mean_adjacency(edge_d2p, n_drug, n_protein)   # [N_prot, N_drug]
    adj_p2d = build_mean_adjacency(edge_p2d, n_protein, n_drug)   # [N_drug, N_prot]

    drug_idx = jax.random.randint(k_idx, (batch,), 0, n_drug)
    protein_idx = jax.random.randint(jax.random.fold_in(k_idx, 1), (batch,), 0, n_protein)

    params = init_params(k_params, drug_in, protein_in, hidden)
    packed = pack_params(params, hidden)
    graph = prepare_graph(x_drug, x_protein, adj_d2p, adj_p2d)

    out = graphsage_forward(graph, packed, drug_idx, protein_idx)
    out = jax.block_until_ready(out)

    assert out.shape == (batch,) and out.dtype == jnp.float32
    assert bool(jnp.all(jnp.isfinite(out)))

    ref = reference_forward(params, x_drug, x_protein, adj_d2p, adj_p2d,
                            drug_idx, protein_idx)
    assert bool(jnp.allclose(out, ref, atol=2e-2, rtol=2e-2)), (out, ref)

    print("KERNEL_OK")
</pallas_src>

<mosaic_0001>
module attributes {stable_mosaic.version = 11 : i64} {
  func.func @_graphsage_fused_kernel(%arg0: memref<8x1xi32, #tpu.memory_space<vmem>>, %arg1: memref<8x1xi32, #tpu.memory_space<vmem>>, %arg2: memref<128x128xbf16, #tpu.memory_space<vmem>>, %arg3: memref<128x128xbf16, #tpu.memory_space<vmem>>, %arg4: memref<128x128xbf16, #tpu.memory_space<vmem>>, %arg5: memref<128x128xbf16, #tpu.memory_space<vmem>>, %arg6: memref<128x128xbf16, #tpu.memory_space<vmem>>, %arg7: memref<1x128xf32, #tpu.memory_space<vmem>>, %arg8: memref<128x128xbf16, #tpu.memory_space<vmem>>, %arg9: memref<1x128xf32, #tpu.memory_space<vmem>>, %arg10: memref<128x128xbf16, #tpu.memory_space<vmem>>, %arg11: memref<1x128xf32, #tpu.memory_space<vmem>>, %arg12: memref<128x128xbf16, #tpu.memory_space<vmem>>, %arg13: memref<128x128xbf16, #tpu.memory_space<vmem>>, %arg14: memref<1x128xf32, #tpu.memory_space<vmem>>, %arg15: memref<128x128xbf16, #tpu.memory_space<vmem>>, %arg16: memref<128x128xbf16, #tpu.memory_space<vmem>>, %arg17: memref<128x128xbf16, #tpu.memory_space<vmem>>, %arg18: memref<1x128xf32, #tpu.memory_space<vmem>>, %arg19: memref<128x128xbf16, #tpu.memory_space<vmem>>, %arg20: memref<1x128xf32, #tpu.memory_space<vmem>>, %arg21: memref<8x128xf32, #tpu.memory_space<vmem>>) attributes {dimension_semantics = [], scalar_prefetch = 0 : i64, scratch_operands = 0 : i64, tpu.core_type = #tpu.core_type<tc>} {
    %c0 = arith.constant 0 : index
    %c0_0 = arith.constant 0 : index
    %0 = vector.load %arg2[%c0, %c0_0] : memref<128x128xbf16, #tpu.memory_space<vmem>>, vector<128x128xbf16>
    %c0_1 = arith.constant 0 : index
    %c0_2 = arith.constant 0 : index
    %1 = vector.load %arg6[%c0_1, %c0_2] : memref<128x128xbf16, #tpu.memory_space<vmem>>, vector<128x128xbf16>
    %cst = arith.constant dense<0.000000e+00> : vector<128x128xf32>
    %2 = tpu.matmul %0, %1, %cst {dimension_numbers = #tpu.dot_dimension_numbers<[1], [0], [0], [1], [0, 0, 1, 1], [], []>} : vector<128x128xbf16>, vector<128x128xbf16>, vector<128x128xf32> -> vector<128x128xf32>
    %c0_3 = arith.constant 0 : index
    %c0_4 = arith.constant 0 : index
    %3 = vector.load %arg7[%c0_3, %c0_4] : memref<1x128xf32, #tpu.memory_space<vmem>>, vector<1x128xf32>
    %4 = vector.broadcast %3 : vector<1x128xf32> to vector<128x128xf32>
    %5 = arith.addf %2, %4 : vector<128x128xf32>
    %c0_5 = arith.constant 0 : index
    %c0_6 = arith.constant 0 : index
    %6 = vector.load %arg3[%c0_5, %c0_6] : memref<128x128xbf16, #tpu.memory_space<vmem>>, vector<128x128xbf16>
    %c0_7 = arith.constant 0 : index
    %c0_8 = arith.constant 0 : index
    %7 = vector.load %arg8[%c0_7, %c0_8] : memref<128x128xbf16, #tpu.memory_space<vmem>>, vector<128x128xbf16>
    %cst_9 = arith.constant dense<0.000000e+00> : vector<128x128xf32>
    %8 = tpu.matmul %6, %7, %cst_9 {dimension_numbers = #tpu.dot_dimension_numbers<[1], [0], [0], [1], [0, 0, 1, 1], [], []>} : vector<128x128xbf16>, vector<128x128xbf16>, vector<128x128xf32> -> vector<128x128xf32>
    %c0_10 = arith.constant 0 : index
    %c0_11 = arith.constant 0 : index
    %9 = vector.load %arg9[%c0_10, %c0_11] : memref<1x128xf32, #tpu.memory_space<vmem>>, vector<1x128xf32>
    %10 = vector.broadcast %9 : vector<1x128xf32> to vector<128x128xf32>
    %11 = arith.addf %8, %10 : vector<128x128xf32>
    %12 = arith.truncf %5 : vector<128x128xf32> to vector<128x128xbf16>
    %13 = arith.truncf %11 : vector<128x128xf32> to vector<128x128xbf16>
    %c0_12 = arith.constant 0 : index
    %c0_13 = arith.constant 0 : index
    %14 = vector.load %arg4[%c0_12, %c0_13] : memref<128x128xbf16, #tpu.memory_space<vmem>>, vector<128x128xbf16>
    %cst_14 = arith.constant dense<0.000000e+00> : vector<128x128xf32>
    %15 = tpu.matmul %14, %12, %cst_14 {dimension_numbers = #tpu.dot_dimension_numbers<[1], [0], [0], [1], [0, 0, 1, 1], [], []>} : vector<128x128xbf16>, vector<128x128xbf16>, vector<128x128xf32> -> vector<128x128xf32>
    %16 = arith.truncf %15 : vector<128x128xf32> to vector<128x128xbf16>
    %c0_15 = arith.constant 0 : index
    %c0_16 = arith.constant 0 : index
    %17 = vector.load %arg10[%c0_15, %c0_16] : memref<128x128xbf16, #tpu.memory_space<vmem>>, vector<128x128xbf16>
    %cst_17 = arith.constant dense<0.000000e+00> : vector<128x128xf32>
    %18 = tpu.matmul %16, %17, %cst_17 {dimension_numbers = #tpu.dot_dimension_numbers<[1], [0], [0], [1], [0, 0, 1, 1], [], []>} : vector<128x128xbf16>, vector<128x128xbf16>, vector<128x128xf32> -> vector<128x128xf32>
    %c0_18 = arith.constant 0 : index
    %c0_19 = arith.constant 0 : index
    %19 = vector.load %arg11[%c0_18, %c0_19] : memref<1x128xf32, #tpu.memory_space<vmem>>, vector<1x128xf32>
    %20 = vector.broadcast %19 : vector<1x128xf32> to vector<128x128xf32>
    %21 = arith.addf %18, %20 : vector<128x128xf32>
    %c0_20 = arith.constant 0 : index
    %c0_21 = arith.constant 0 : index
    %22 = vector.load %arg12[%c0_20, %c0_21] : memref<128x128xbf16, #tpu.memory_space<vmem>>, vector<128x128xbf16>
    %cst_22 = arith.constant dense<0.000000e+00> : vector<128x128xf32>
    %23 = tpu.matmul %13, %22, %cst_22 {dimension_numbers = #tpu.dot_dimension_numbers<[1], [0], [0], [1], [0, 0, 1, 1], [], []>} : vector<128x128xbf16>, vector<128x128xbf16>, vector<128x128xf32> -> vector<128x128xf32>
    %24 = arith.addf %21, %23 : vector<128x128xf32>
    %c0_23 = arith.constant 0 : index
    %c0_24 = arith.constant 0 : index
    %25 = vector.load %arg5[%c0_23, %c0_24] : memref<128x128xbf16, #tpu.memory_space<vmem>>, vector<128x128xbf16>
    %cst_25 = arith.constant dense<0.000000e+00> : vector<128x128xf32>
    %26 = tpu.matmul %25, %13, %cst_25 {dimension_numbers = #tpu.dot_dimension_numbers<[1], [0], [0], [1], [0, 0, 1, 1], [], []>} : vector<128x128xbf16>, vector<128x128xbf16>, vector<128x128xf32> -> vector<128x128xf32>
    %27 = arith.truncf %26 : vector<128x128xf32> to vector<128x128xbf16>
    %c0_26 = arith.constant 0 : index
    %c0_27 = arith.constant 0 : index
    %28 = vector.load %arg13[%c0_26, %c0_27] : memref<128x128xbf16, #tpu.memory_space<vmem>>, vector<128x128xbf16>
    %cst_28 = arith.constant dense<0.000000e+00> : vector<128x128xf32>
    %29 = tpu.matmul %27, %28, %cst_28 {dimension_numbers = #tpu.dot_dimension_numbers<[1], [0], [0], [1], [0, 0, 1, 1], [], []>} : vector<128x128xbf16>, vector<128x128xbf16>, vector<128x128xf32> -> vector<128x128xf32>
    %c0_29 = arith.constant 0 : index
    %c0_30 = arith.constant 0 : index
    %30 = vector.load %arg14[%c0_29, %c0_30] : memref<1x128xf32, #tpu.memory_space<vmem>>, vector<1x128xf32>
    %31 = vector.broadcast %30 : vector<1x128xf32> to vector<128x128xf32>
    %32 = arith.addf %29, %31 : vector<128x128xf32>
    %c0_31 = arith.constant 0 : index
    %c0_32 = arith.constant 0 : index
    %33 = vector.load %arg15[%c0_31, %c0_32] : memref<128x128xbf16, #tpu.memory_space<vmem>>, vector<128x128xbf16>
    %cst_33 = arith.constant dense<0.000000e+00> : vector<128x128xf32>
    %34 = tpu.matmul %12, %33, %cst_33 {dimension_numbers = #tpu.dot_dimension_numbers<[1], [0], [0], [1], [0, 0, 1, 1], [], []>} : vector<128x128xbf16>, vector<128x128xbf16>, vector<128x128xf32> -> vector<128x128xf32>
    %35 = arith.addf %32, %34 : vector<128x128xf32>
    %36 = tpu.iota {dimensions = array<i32: 1>} : vector<8x128xi32>
    %c0_34 = arith.constant 0 : index
    %c0_35 = arith.constant 0 : index
    %37 = vector.load %arg0[%c0_34, %c0_35] : memref<8x1xi32, #tpu.memory_space<vmem>>, vector<8x1xi32>
    %38 = vector.broadcast %37 : vector<8x1xi32> to vector<8x128xi32>
    %39 = arith.cmpi eq, %36, %38 : vector<8x128xi32>
    %40 = arith.extui %39 : vector<8x128xi1> to vector<8x128xi32>
    %41 = arith.sitofp %40 : vector<8x128xi32> to vector<8x128xf32>
    %42 = tpu.iota {dimensions = array<i32: 1>} : vector<8x128xi32>
    %c0_36 = arith.constant 0 : index
    %c0_37 = arith.constant 0 : index
    %43 = vector.load %arg1[%c0_36, %c0_37] : memref<8x1xi32, #tpu.memory_space<vmem>>, vector<8x1xi32>
    %44 = vector.broadcast %43 : vector<8x1xi32> to vector<8x128xi32>
    %45 = arith.cmpi eq, %42, %44 : vector<8x128xi32>
    %46 = arith.extui %45 : vector<8x128xi1> to vector<8x128xi32>
    %47 = arith.sitofp %46 : vector<8x128xi32> to vector<8x128xf32>
    %cst_38 = arith.constant dense<0.000000e+00> : vector<8x128xf32>
    %48 = tpu.matmul %41, %35, %cst_38 {dimension_numbers = #tpu.dot_dimension_numbers<[1], [0], [0], [1], [0, 0, 1, 1], [], []>} : vector<8x128xf32>, vector<128x128xf32>, vector<8x128xf32> -> vector<8x128xf32>
    %cst_39 = arith.constant dense<0.000000e+00> : vector<8x128xf32>
    %49 = tpu.matmul %47, %24, %cst_39 {dimension_numbers = #tpu.dot_dimension_numbers<[1], [0], [0], [1], [0, 0, 1, 1], [], []>} : vector<8x128xf32>, vector<128x128xf32>, vector<8x128xf32> -> vector<8x128xf32>
    %50 = arith.truncf %48 : vector<8x128xf32> to vector<8x128xbf16>
    %c0_40 = arith.constant 0 : index
    %c0_41 = arith.constant 0 : index
    %51 = vector.load %arg16[%c0_40, %c0_41] : memref<128x128xbf16, #tpu.memory_space<vmem>>, vector<128x128xbf16>
    %cst_42 = arith.constant dense<0.000000e+00> : vector<8x128xf32>
    %52 = tpu.matmul %50, %51, %cst_42 {dimension_numbers = #tpu.dot_dimension_numbers<[1], [0], [0], [1], [0, 0, 1, 1], [], []>} : vector<8x128xbf16>, vector<128x128xbf16>, vector<8x128xf32> -> vector<8x128xf32>
    %53 = arith.truncf %49 : vector<8x128xf32> to vector<8x128xbf16>
    %c0_43 = arith.constant 0 : index
    %c0_44 = arith.constant 0 : index
    %54 = vector.load %arg17[%c0_43, %c0_44] : memref<128x128xbf16, #tpu.memory_space<vmem>>, vector<128x128xbf16>
    %cst_45 = arith.constant dense<0.000000e+00> : vector<8x128xf32>
    %55 = tpu.matmul %53, %54, %cst_45 {dimension_numbers = #tpu.dot_dimension_numbers<[1], [0], [0], [1], [0, 0, 1, 1], [], []>} : vector<8x128xbf16>, vector<128x128xbf16>, vector<8x128xf32> -> vector<8x128xf32>
    %56 = arith.addf %52, %55 : vector<8x128xf32>
    %c0_46 = arith.constant 0 : index
    %c0_47 = arith.constant 0 : index
    %57 = vector.load %arg18[%c0_46, %c0_47] : memref<1x128xf32, #tpu.memory_space<vmem>>, vector<1x128xf32>
    %58 = vector.broadcast %57 : vector<1x128xf32> to vector<8x128xf32>
    %59 = arith.addf %56, %58 : vector<8x128xf32>
    %cst_48 = arith.constant 0.000000e+00 : f32
    %60 = vector.broadcast %cst_48 : f32 to vector<8x128xf32>
    %61 = arith.maximumf %59, %60 : vector<8x128xf32>
    %62 = arith.truncf %61 : vector<8x128xf32> to vector<8x128xbf16>
    %c0_49 = arith.constant 0 : index
    %c0_50 = arith.constant 0 : index
    %63 = vector.load %arg19[%c0_49, %c0_50] : memref<128x128xbf16, #tpu.memory_space<vmem>>, vector<128x128xbf16>
    %cst_51 = arith.constant dense<0.000000e+00> : vector<8x128xf32>
    %64 = tpu.matmul %62, %63, %cst_51 {dimension_numbers = #tpu.dot_dimension_numbers<[1], [0], [0], [1], [0, 0, 1, 1], [], []>} : vector<8x128xbf16>, vector<128x128xbf16>, vector<8x128xf32> -> vector<8x128xf32>
    %c0_52 = arith.constant 0 : index
    %c0_53 = arith.constant 0 : index
    %65 = vector.load %arg20[%c0_52, %c0_53] : memref<1x128xf32, #tpu.memory_space<vmem>>, vector<1x128xf32>
    %66 = vector.broadcast %65 : vector<1x128xf32> to vector<8x128xf32>
    %67 = arith.addf %64, %66 : vector<8x128xf32>
    %c0_54 = arith.constant 0 : index
    %c0_55 = arith.constant 0 : index
    %68 = vector.load %arg21[%c0_54, %c0_55] : memref<8x128xf32, #tpu.memory_space<vmem>>, vector<8x128xf32>
    tpu.vector_store %arg21[%c0_54, %c0_55], %67 {strides = array<i32>} : memref<8x128xf32, #tpu.memory_space<vmem>>, vector<8x128xf32>,
    return
  }
}

</mosaic_0001>

<bundles_post_ra>
// kernel: graphsage_forward.1
= control target key start
LH: loop header
LB: loop body
LE: loop exit
PB: predicated region body
PF: predicated region fallthrough
CT: control target
= control target key end

     0   :  { %s4086_s0 = inlined_call_operand.vmem [shape: s32[8,1], index: 0, kind: input, shape index: {}]   ;;  %s4087_s1 = inlined_call_operand.vmem [shape: s32[8,1], index: 1, kind: input, shape index: {}]   ;;  %s4088_s2 = inlined_call_operand.hbm [shape: bf16[128,128], index: 2, kind: input, shape index: {}]   ;;  %s4089_s3 = inlined_call_operand.hbm [shape: bf16[128,128], index: 3, kind: input, shape index: {}]   ;;  %s4090_s4 = inlined_call_operand.hbm [shape: bf16[128,128], index: 4, kind: input, shape index: {}]   ;;  %s4091_s5 = inlined_call_operand.hbm [shape: bf16[128,128], index: 5, kind: input, shape index: {}]   ;;  %s4092_s6 = inlined_call_operand.hbm [shape: bf16[128,128], index: 6, kind: input, shape index: {}]   ;;  %s4093_s7 = inlined_call_operand.vmem [shape: f32[1,128], index: 7, kind: input, shape index: {}]   ;;  %s4094_s8 = inlined_call_operand.vmem [shape: bf16[128,128], index: 8, kind: input, shape index: {}]   ;;  %s4095_s9 = inlined_call_operand.vmem [shape: f32[1,128], index: 9, kind: input, shape index: {}]   ;;  %s4096_s10 = inlined_call_operand.hbm [shape: bf16[128,128], index: 10, kind: input, shape index: {}]   ;;  %s4097_s11 = inlined_call_operand.vmem [shape: f32[1,128], index: 11, kind: input, shape index: {}]   ;;  %s4098_s12 = inlined_call_operand.hbm [shape: bf16[128,128], index: 12, kind: input, shape index: {}]   ;;  %s4099_s13 = inlined_call_operand.hbm [shape: bf16[128,128], index: 13, kind: input, shape index: {}]   ;;  %s4100_s14 = inlined_call_operand.vmem [shape: f32[1,128], index: 14, kind: input, shape index: {}]   ;;  %s4101_s15 = inlined_call_operand.hbm [shape: bf16[128,128], index: 15, kind: input, shape index: {}]   ;;  %s4102_s16 = inlined_call_operand.hbm [shape: bf16[128,128], index: 16, kind: input, shape index: {}]   ;;  %s4103_s17 = inlined_call_operand.hbm [shape: bf16[128,128], index: 17, kind: input, shape index: {}]   ;;  %s4104_s18 = inlined_call_operand.vmem [shape: f32[1,128], index: 18, kind: input, shape index: {}]   ;;  %s4105_s19 = inlined_call_operand.hbm [shape: bf16[128,128], index: 19, kind: input, shape index: {}]   ;;  %s4106_s20 = inlined_call_operand.vmem [shape: f32[1,128], index: 20, kind: input, shape index: {}]   ;;  %s4107_s21 = inlined_call_operand.vmem [shape: f32[8,128], index: 21, kind: output, shape index: {}]  }
   0x1   :  { %4112 = sst [smem:[#allocation28_spill]] %s4086_s0 }
   0x2   :  { %4113 = sst [smem:[#allocation29_spill]] %s4087_s1 }
   0x3   :  { %4114 = sst [smem:[#allocation30_spill]] %s4088_s2 }
   0x4   :  { %4115 = sst [smem:[#allocation31_spill]] %s4089_s3 }
   0x5   :  { %4116 = sst [smem:[#allocation32_spill]] %s4090_s4 }
   0x6   :  { %4117 = sst [smem:[#allocation33_spill]] %s4091_s5 }
   0x7   :  { %4118 = sst [smem:[#allocation34_spill]] %s4106_s20 }
   0x8   :  { %4119 = sst [smem:[#allocation35_spill]] %s4107_s21 }
   0x9   :  { %26 = vsyncpa [#allocation3], 0 }
   0xa   :  { %27 = vsyncpa [#allocation5], 0 }
   0xb   :  { %28 = vsyncpa [#allocation8], 0 }
   0xc   :  { %29 = vsyncpa [#allocation11], 0 }
   0xd   :  { %30 = vsyncpa [#allocation14], 0 }
   0xe   :  { %31 = vsyncpa [#allocation17], 0 }
   0xf   :  { %32 = vsyncpa [#allocation20], 0  ;;  %s3442_s2 = smov [#allocation4]   ;;  %s3443_s26 = smov [#allocation7]  }
  0x10   :  { %s54_s25 = sshll.u32 %s3442_s2, 4  ;;  %s78_s27 = sshll.u32 %s3443_s26, 4  ;;  %s55_s25 = int_to_ptr.vmem [resolvable:$true] %s54_s25  ;;  %s3571_s27 = int_to_ptr.vmem [resolvable:$true] %s78_s27 }
  0x11   :  { %s4120_s29 = sld [smem:[#allocation31_spill]] }
  0x17   :  { %s3164_s0 = scalar_lea.hbm %s4120_s29, 1024 }
  0x18   :  { %p3165_p0 = scmp.ne.s32.totalorder %s4120_s29, %s3164_s0  ;;  %p3168_p1 = scmp.lt.u32.totalorder %s3164_s0, %s4120_s29 }
  0x1a   :  { %p3170_p2 = pnand %p3168_p1, %p3165_p0 }
  0x1c   :  { %3173 = shalt.err (!%p3170_p2)
}
  0x1d   :  { %s3174_s23 = scalar_lea.vmem %s55_s25, 1024  ;;  %p3179_p4 = scmp.lt.s32.totalorder %s55_s25, %s55_s25 }
  0x1e   :  { %p3175_p3 = scmp.ne.s32.totalorder %s55_s25, %s3174_s23  ;;  %p3180_p5 = scmp.lt.s32.totalorder %s3174_s23, %s3174_s23 }
  0x20   :  { %p3181_p6 = por %p3180_p5, %p3179_p4 }
  0x22   :  { %p3182_p7 = pnand %p3181_p6, %p3175_p3 }
  0x24   :  { %3185 = shalt.err (!%p3182_p7)
}
  0x25   :  { %s3444_s1 = smov 64   ;;  %s3445_s24 = smov 4  }
  0x26   :  { %60 = dma.hbm_to_vmem [thread:$0]  %s4120_s29, 1024, %s55_s25, [#allocation5], %s3444_s1, %s3444_s1, %s3445_s24  }
  0x27   :  { %s4121_s0 = sld [smem:[#allocation33_spill]] }
  0x2d   :  { %s3186_s4 = scalar_lea.hbm %s4121_s0, 1024 }
  0x2e   :  { %p3187_p8 = scmp.ne.s32.totalorder %s4121_s0, %s3186_s4  ;;  %p3190_p9 = scmp.lt.u32.totalorder %s3186_s4, %s4121_s0 }
  0x30   :  { %p3192_p10 = pnand %p3190_p9, %p3187_p8 }
  0x32   :  { %3195 = shalt.err (!%p3192_p10)
}
  0x33   :  { %s3196_s21 = scalar_lea.vmem %s3571_s27, 1024  ;;  %p3201_p12 = scmp.lt.s32.totalorder %s3571_s27, %s3571_s27 }
  0x34   :  { %p3197_p11 = scmp.ne.s32.totalorder %s3571_s27, %s3196_s21  ;;  %p3202_p13 = scmp.lt.s32.totalorder %s3196_s21, %s3196_s21 }
  0x36   :  { %p3203_p0 = por %p3202_p13, %p3201_p12 }
  0x38   :  { %p3204_p1 = pnand %p3203_p0, %p3197_p11 }
  0x3a   :  { %3207 = shalt.err (!%p3204_p1)
}
  0x3b   :  { %84 = dma.hbm_to_vmem [thread:$0]  %s4121_s0, 1024, %s3571_s27, [#allocation8], %s3444_s1, %s3444_s1, %s3445_s24  }
  0x3c   :  { %s3446_s2 = smov [#allocation10]   ;;  %s3447_s3 = smov [#allocation13]  }
  0x3d   :  { %s108_s26 = sshll.u32 %s3446_s2, 4  ;;  %s134_s28 = sshll.u32 %s3447_s3, 4  ;;  %s109_s26 = int_to_ptr.vmem [resolvable:$true] %s108_s26  ;;  %s3608_s28 = int_to_ptr.vmem [resolvable:$true] %s134_s28 }
  0x3e   :  { %s3208_s30 = scalar_lea.hbm %s4096_s10, 1024 }
  0x3f   :  { %p3209_p2 = scmp.ne.s32.totalorder %s4096_s10, %s3208_s30  ;;  %p3212_p3 = scmp.lt.u32.totalorder %s3208_s30, %s4096_s10 }
  0x41   :  { %p3214_p4 = pnand %p3212_p3, %p3209_p2 }
  0x43   :  { %3217 = shalt.err (!%p3214_p4)
}
  0x44   :  { %s3218_s27 = scalar_lea.vmem %s109_s26, 1024  ;;  %p3223_p6 = scmp.lt.s32.totalorder %s109_s26, %s109_s26 }
  0x45   :  { %p3219_p5 = scmp.ne.s32.totalorder %s109_s26, %s3218_s27  ;;  %p3224_p7 = scmp.lt.s32.totalorder %s3218_s27, %s3218_s27 }
  0x47   :  { %p3225_p8 = por %p3224_p7, %p3223_p6 }
  0x49   :  { %p3226_p9 = pnand %p3225_p8, %p3219_p5 }
  0x4b   :  { %3229 = shalt.err (!%p3226_p9)
}
  0x4c   :  { %114 = dma.hbm_to_vmem [thread:$0]  %s4096_s10, 1024, %s109_s26, [#allocation11], %s3444_s1, %s3444_s1, %s3445_s24  }
  0x4d   :  { %s3230_s20 = scalar_lea.hbm %s4099_s13, 1024 }
  0x4e   :  { %p3231_p10 = scmp.ne.s32.totalorder %s4099_s13, %s3230_s20  ;;  %p3234_p11 = scmp.lt.u32.totalorder %s3230_s20, %s4099_s13 }
  0x50   :  { %p3236_p12 = pnand %p3234_p11, %p3231_p10 }
  0x52   :  { %3239 = shalt.err (!%p3236_p12)
}
  0x53   :  { %s3240_s5 = scalar_lea.vmem %s3608_s28, 1024  ;;  %p3245_p0 = scmp.lt.s32.totalorder %s3608_s28, %s3608_s28 }
  0x54   :  { %p3241_p13 = scmp.ne.s32.totalorder %s3608_s28, %s3240_s5  ;;  %p3246_p1 = scmp.lt.s32.totalorder %s3240_s5, %s3240_s5 }
  0x56   :  { %p3247_p2 = por %p3246_p1, %p3245_p0 }
  0x58   :  { %p3248_p3 = pnand %p3247_p2, %p3241_p13 }
  0x5a   :  { %3251 = shalt.err (!%p3248_p3)
}
  0x5b   :  { %140 = dma.hbm_to_vmem [thread:$0]  %s4099_s13, 1024, %s3608_s28, [#allocation14], %s3444_s1, %s3444_s1, %s3445_s24  }
  0x5c   :  { %s3448_s22 = smov [#allocation16]   ;;  %s3449_s27 = smov [#allocation2]  }
  0x5d   :  { %s160_s23 = sshll.u32 %s3448_s22, 4  ;;  %s42_s0 = sshll.u32 %s3449_s27, 4  ;;  %s161_s23 = int_to_ptr.vmem [resolvable:$true] %s160_s23  ;;  %s3645_s0 = int_to_ptr.vmem [resolvable:$true] %s42_s0 }
  0x5e   :  { %s3252_s2 = scalar_lea.hbm %s4102_s16, 1024 }
  0x5f   :  { %p3253_p4 = scmp.ne.s32.totalorder %s4102_s16, %s3252_s2  ;;  %p3256_p5 = scmp.lt.u32.totalorder %s3252_s2, %s4102_s16 }
  0x61   :  { %p3258_p6 = pnand %p3256_p5, %p3253_p4 }
  0x63   :  { %3261 = shalt.err (!%p3258_p6)
}
  0x64   :  { %s3262_s13 = scalar_lea.vmem %s161_s23, 1024  ;;  %p3267_p8 = scmp.lt.s32.totalorder %s161_s23, %s161_s23 }
  0x65   :  { %p3263_p7 = scmp.ne.s32.totalorder %s161_s23, %s3262_s13  ;;  %p3268_p9 = scmp.lt.s32.totalorder %s3262_s13, %s3262_s13 }
  0x67   :  { %p3269_p10 = por %p3268_p9, %p3267_p8 }
  0x69   :  { %p3270_p11 = pnand %p3269_p10, %p3263_p7 }
  0x6b   :  { %3273 = shalt.err (!%p3270_p11)
}
  0x6c   :  { %166 = dma.hbm_to_vmem [thread:$0]  %s4102_s16, 1024, %s161_s23, [#allocation17], %s3444_s1, %s3444_s1, %s3445_s24  }
  0x6d   :  { %s4122_s26 = sld [smem:[#allocation30_spill]] }
  0x73   :  { %s3274_s22 = scalar_lea.hbm %s4122_s26, 1024 }
  0x74   :  { %p3275_p12 = scmp.ne.s32.totalorder %s4122_s26, %s3274_s22  ;;  %p3278_p13 = scmp.lt.u32.totalorder %s3274_s22, %s4122_s26 }
  0x76   :  { %p3280_p0 = pnand %p3278_p13, %p3275_p12 }
  0x78   :  { %3283 = shalt.err (!%p3280_p0)
}
  0x79   :  { %s3284_s20 = scalar_lea.vmem %s3645_s0, 1024  ;;  %p3289_p2 = scmp.lt.s32.totalorder %s3645_s0, %s3645_s0 }
  0x7a   :  { %p3285_p1 = scmp.ne.s32.totalorder %s3645_s0, %s3284_s20  ;;  %p3290_p3 = scmp.lt.s32.totalorder %s3284_s20, %s3284_s20 }
  0x7c   :  { %p3291_p4 = por %p3290_p3, %p3289_p2 }
  0x7e   :  { %p3292_p5 = pnand %p3291_p4, %p3285_p1 }
  0x80   :  { %3295 = shalt.err (!%p3292_p5)
}
  0x81   :  { %48 = dma.hbm_to_vmem [thread:$0]  %s4122_s26, 1024, %s3645_s0, [#allocation3], %s3444_s1, %s3444_s1, %s3445_s24  }
  0x82   :  { %s3450_s3 = smov [#allocation6]   ;;  %s3451_s21 = smov [#allocation9]  }
  0x83   :  { %s66_s4 = sshll.u32 %s3450_s3, 4  ;;  %s90_s13 = sshll.u32 %s3451_s21, 4  ;;  %s67_s4 = int_to_ptr.vmem [resolvable:$true] %s66_s4  ;;  %s3682_s13 = int_to_ptr.vmem [resolvable:$true] %s90_s13 }
  0x84   :  { %s4123_s5 = sld [smem:[#allocation32_spill]] }
  0x8a   :  { %s3296_s10 = scalar_lea.hbm %s4123_s5, 1024 }
  0x8b   :  { %p3297_p6 = scmp.ne.s32.totalorder %s4123_s5, %s3296_s10  ;;  %p3300_p7 = scmp.lt.u32.totalorder %s3296_s10, %s4123_s5 }
  0x8d   :  { %p3302_p8 = pnand %p3300_p7, %p3297_p6 }
  0x8f   :  { %3305 = shalt.err (!%p3302_p8)
}
  0x90   :  { %s3306_s0 = scalar_lea.vmem %s67_s4, 1024  ;;  %p3311_p10 = scmp.lt.s32.totalorder %s67_s4, %s67_s4 }
  0x91   :  { %p3307_p9 = scmp.ne.s32.totalorder %s67_s4, %s3306_s0  ;;  %p3312_p11 = scmp.lt.s32.totalorder %s3306_s0, %s3306_s0 }
  0x93   :  { %p3313_p12 = por %p3312_p11, %p3311_p10 }
  0x95   :  { %p3314_p13 = pnand %p3313_p12, %p3307_p9 }
  0x97   :  { %3317 = shalt.err (!%p3314_p13)
}
  0x98   :  { %72 = dma.hbm_to_vmem [thread:$0]  %s4123_s5, 1024, %s67_s4, [#allocation5], %s3444_s1, %s3444_s1, %s3445_s24  }
  0x99   :  { %s3318_s23 = scalar_lea.hbm %s4092_s6, 1024 }
  0x9a   :  { %p3319_p0 = scmp.ne.s32.totalorder %s4092_s6, %s3318_s23  ;;  %p3322_p1 = scmp.lt.u32.totalorder %s3318_s23, %s4092_s6 }
  0x9c   :  { %p3324_p2 = pnand %p3322_p1, %p3319_p0 }
  0x9e   :  { %3327 = shalt.err (!%p3324_p2)
}
  0x9f   :  { %s3328_s10 = scalar_lea.vmem %s3682_s13, 1024  ;;  %p3333_p4 = scmp.lt.s32.totalorder %s3682_s13, %s3682_s13 }
  0xa0   :  { %p3329_p3 = scmp.ne.s32.totalorder %s3682_s13, %s3328_s10  ;;  %p3334_p5 = scmp.lt.s32.totalorder %s3328_s10, %s3328_s10 }
  0xa2   :  { %p3335_p6 = por %p3334_p5, %p3333_p4 }
  0xa4   :  { %p3336_p7 = pnand %p3335_p6, %p3329_p3 }
  0xa6   :  { %3339 = shalt.err (!%p3336_p7)
}
  0xa7   :  { %96 = dma.hbm_to_vmem [thread:$0]  %s4092_s6, 1024, %s3682_s13, [#allocation8], %s3444_s1, %s3444_s1, %s3445_s24  }
  0xa8   :  { %s3452_s22 = smov [#allocation12]   ;;  %s3453_s25 = smov [#allocation15]  }
  0xa9   :  { %s122_s27 = sshll.u32 %s3452_s22, 4  ;;  %s148_s29 = sshll.u32 %s3453_s25, 4  ;;  %s123_s27 = int_to_ptr.vmem [resolvable:$true] %s122_s27  ;;  %s3719_s29 = int_to_ptr.vmem [resolvable:$true] %s148_s29 }
  0xaa   :  { %s3340_s2 = scalar_lea.hbm %s4098_s12, 1024 }
  0xab   :  { %p3341_p8 = scmp.ne.s32.totalorder %s4098_s12, %s3340_s2  ;;  %p3344_p9 = scmp.lt.u32.totalorder %s3340_s2, %s4098_s12 }
  0xad   :  { %p3346_p10 = pnand %p3344_p9, %p3341_p8 }
  0xaf   :  { %3349 = shalt.err (!%p3346_p10)
}
  0xb0   :  { %s3350_s6 = scalar_lea.vmem %s123_s27, 1024  ;;  %p3355_p12 = scmp.lt.s32.totalorder %s123_s27, %s123_s27 }
  0xb1   :  { %p3351_p11 = scmp.ne.s32.totalorder %s123_s27, %s3350_s6  ;;  %p3356_p13 = scmp.lt.s32.totalorder %s3350_s6, %s3350_s6 }
  0xb3   :  { %p3357_p0 = por %p3356_p13, %p3355_p12 }
  0xb5   :  { %p3358_p1 = pnand %p3357_p0, %p3351_p11 }
  0xb7   :  { %3361 = shalt.err (!%p3358_p1)
}
  0xb8   :  { %128 = dma.hbm_to_vmem [thread:$0]  %s4098_s12, 1024, %s123_s27, [#allocation11], %s3444_s1, %s3444_s1, %s3445_s24  }
  0xb9   :  { %s3362_s10 = scalar_lea.hbm %s4101_s15, 1024 }
  0xba   :  { %p3363_p2 = scmp.ne.s32.totalorder %s4101_s15, %s3362_s10  ;;  %p3366_p3 = scmp.lt.u32.totalorder %s3362_s10, %s4101_s15 }
  0xbc   :  { %p3368_p4 = pnand %p3366_p3, %p3363_p2 }
  0xbe   :  { %3371 = shalt.err (!%p3368_p4)
}
  0xbf   :  { %s3372_s0 = scalar_lea.vmem %s3719_s29, 1024  ;;  %p3377_p6 = scmp.lt.s32.totalorder %s3719_s29, %s3719_s29 }
  0xc0   :  { %p3373_p5 = scmp.ne.s32.totalorder %s3719_s29, %s3372_s0  ;;  %p3378_p7 = scmp.lt.s32.totalorder %s3372_s0, %s3372_s0 }
  0xc2   :  { %p3379_p8 = por %p3378_p7, %p3377_p6 }
  0xc4   :  { %p3380_p9 = pnand %p3379_p8, %p3373_p5 }
  0xc6   :  { %3383 = shalt.err (!%p3380_p9)
}
  0xc7   :  { %154 = dma.hbm_to_vmem [thread:$0]  %s4101_s15, 1024, %s3719_s29, [#allocation14], %s3444_s1, %s3444_s1, %s3445_s24  }
  0xc8   :  { %s3454_s26 = smov [#allocation18]   ;;  %s3455_s20 = smov [#allocation19]  }
  0xc9   :  { %s172_s2 = sshll.u32 %s3454_s26, 4  ;;  %s186_s16 = sshll.u32 %s3455_s20, 4  ;;  %s173_s2 = int_to_ptr.vmem [resolvable:$true] %s172_s2  ;;  %s3756_s16 = int_to_ptr.vmem [resolvable:$true] %s186_s16 }
  0xca   :  { %s3384_s6 = scalar_lea.hbm %s4103_s17, 1024 }
  0xcb   :  { %p3385_p10 = scmp.ne.s32.totalorder %s4103_s17, %s3384_s6  ;;  %p3388_p11 = scmp.lt.u32.totalorder %s3384_s6, %s4103_s17 }
  0xcd   :  { %p3390_p12 = pnand %p3388_p11, %p3385_p10 }
  0xcf   :  { %3393 = shalt.err (!%p3390_p12)
}
  0xd0   :  { %s3394_s15 = scalar_lea.vmem %s173_s2, 1024  ;;  %p3399_p0 = scmp.lt.s32.totalorder %s173_s2, %s173_s2 }
  0xd1   :  { %p3395_p13 = scmp.ne.s32.totalorder %s173_s2, %s3394_s15  ;;  %p3400_p1 = scmp.lt.s32.totalorder %s3394_s15, %s3394_s15 }
  0xd3   :  { %p3401_p2 = por %p3400_p1, %p3399_p0 }
  0xd5   :  { %p3402_p3 = pnand %p3401_p2, %p3395_p13 }
  0xd7   :  { %3405 = shalt.err (!%p3402_p3)
}
  0xd8   :  { %178 = dma.hbm_to_vmem [thread:$0]  %s4103_s17, 1024, %s173_s2, [#allocation17], %s3444_s1, %s3444_s1, %s3445_s24  }
  0xd9   :  { %s3406_s22 = scalar_lea.hbm %s4105_s19, 1024 }
  0xda   :  { %p3407_p4 = scmp.ne.s32.totalorder %s4105_s19, %s3406_s22  ;;  %p3410_p5 = scmp.lt.u32.totalorder %s3406_s22, %s4105_s19 }
  0xdc   :  { %p3412_p6 = pnand %p3410_p5, %p3407_p4 }
  0xde   :  { %3415 = shalt.err (!%p3412_p6)
}
  0xdf   :  { %s3416_s26 = scalar_lea.vmem %s3756_s16, 1024  ;;  %p3421_p8 = scmp.lt.s32.totalorder %s3756_s16, %s3756_s16 }
  0xe0   :  { %p3417_p7 = scmp.ne.s32.totalorder %s3756_s16, %s3416_s26  ;;  %p3422_p9 = scmp.lt.s32.totalorder %s3416_s26, %s3416_s26 }
  0xe2   :  { %p3423_p10 = por %p3422_p9, %p3421_p8 }
  0xe4   :  { %p3424_p11 = pnand %p3423_p10, %p3417_p7 }
  0xe6   :  { %3427 = shalt.err (!%p3424_p11)
}
  0xe7   :  { %192 = dma.hbm_to_vmem [thread:$0]  %s4105_s19, 1024, %s3756_s16, [#allocation20], %s3444_s1, %s3444_s1, %s3445_s24  }
  0xe8   :  { %3428 = dma.done.wait [#allocation3], 1024  }
  0xe9   :  { %3429 = vsyncadd [#allocation3], 4294966272 }
  0xea   :  { %3430 = dma.done.wait [#allocation5], 2048  }
  0xeb   :  { %3431 = vsyncadd [#allocation5], 4294965248 }
  0xec   :  { %3432 = dma.done.wait [#allocation8], 2048  }
  0xed   :  { %3433 = vsyncadd [#allocation8], 4294965248 }
  0xee   :  { %3434 = dma.done.wait [#allocation11], 2048  }
  0xef   :  { %3435 = vsyncadd [#allocation11], 4294965248 }
  0xf0   :  { %3436 = dma.done.wait [#allocation14], 2048  }
  0xf1   :  { %3437 = vsyncadd [#allocation14], 4294965248 }
  0xf2   :  { %3438 = dma.done.wait [#allocation17], 2048  }
  0xf3   :  { %3439 = vsyncadd [#allocation17], 4294965248 }
  0xf4   :  { %3440 = dma.done.wait [#allocation20], 1024  }
  0xf5   :  { %3441 = vsyncadd [#allocation20], 4294966272  ;;  %v3060_v0 = vld [vmem:[#allocation9] sm:$0xff]   ;;  %v3061_v1 = vld [vmem:[#allocation9 + $0x8] sm:$0xff]   ;;  %s4124_s0 = sld [smem:[#allocation28_spill]]  ;;  %s4125_s26 = sld [smem:[#allocation29_spill]] }
  0xf6   :  { %2542 = vmatprep.subr.bf16.mxu0 %v3060_v0  ;;  %v3062_v2 = vld [vmem:[#allocation9 + $0x10] sm:$0xff]   ;;  %v3063_v3 = vld [vmem:[#allocation9 + $0x18] sm:$0xff]   ;;  %v3068_v4 = vld [vmem:[%s4094_s8] sm:$0xff]   ;;  %vm3458_vm0 = vmmov 0   ;;  %s4126_s16 = sld [smem:[#allocation34_spill]]  ;;  %s4127_s6 = sld [smem:[#allocation35_spill]] }
  0xf7   :  { %2543 = vmatpush3.bf16.msra.mxu0 %v3060_v0  ;;  %v3069_v5 = vld [vmem:[#allocation2] sm:$0xff]   ;;  %2574 = vmatprep.subr.bf16.mxu1 %v3068_v4  ;;  %v3071_v7 = vld [vmem:[%s4094_s8 + $0x8] sm:$0xff]   ;;  %v3072_v8 = vld [vmem:[%s4094_s8 + $0x10] sm:$0xff]  }
  0xf8   :  { %2544 = vmatprep.subr.bf16.mxu0 %v3061_v1  ;;  %v3064_v6 = vld [vmem:[#allocation9 + $0x20] sm:$0xff]   ;;  %2575 = vmatpush3.bf16.msra.mxu1 %v3068_v4  ;;  %v3065_v9 = vld [vmem:[#allocation9 + $0x28] sm:$0xff]   ;;  %v3075_v10 = vld [vmem:[%s4094_s8 + $0x18] sm:$0xff]  }
  0xf9   :  { %2558 = vmatprep.mubr.bf16.mxu0 %v3069_v5  ;;  %2576 = vmatprep.subr.bf16.mxu1 %v3071_v7  ;;  %v3066_v11 = vld [vmem:[#allocation9 + $0x30] sm:$0xff]   ;;  %v3076_v12 = vld [vmem:[%s4094_s8 + $0x20] sm:$0xff]   ;;  %v3067_v13 = vld [vmem:[#allocation9 + $0x38] sm:$0xff]  }
  0xfa   :  { %v3079_v14 = vld [vmem:[%s4094_s8 + $0x28] sm:$0xff]   ;;  %v3084_v15 = vld [vmem:[#allocation4] sm:$0xff]   ;;  %v3080_v16 = vld [vmem:[%s4094_s8 + $0x30] sm:$0xff]  }
  0xfb   :  { %2545 = vmatpush3.bf16.msra.mxu0 %v3061_v1  ;;  %2590 = vmatprep.mubr.bf16.mxu1 %v3084_v15  ;;  %v3070_v17 = vld [vmem:[#allocation2 + $0x8] sm:$0xff]   ;;  %v3073_v18 = vld [vmem:[#allocation2 + $0x10] sm:$0xff]   ;;  %v3083_v19 = vld [vmem:[%s4094_s8 + $0x38] sm:$0xff]  }
  0xfc   :  { %2546 = vmatprep.subr.bf16.mxu0 %v3062_v2  ;;  %2577 = vmatpush3.bf16.msra.mxu1 %v3071_v7  ;;  %v3074_v20 = vld [vmem:[#allocation2 + $0x18] sm:$0xff]   ;;  %v3085_v21 = vld [vmem:[#allocation4 + $0x8] sm:$0xff]   ;;  %v3077_v22 = vld [vmem:[#allocation2 + $0x20] sm:$0xff]  }
  0xfd   :  { %2578 = vmatprep.subr.bf16.mxu1 %v3072_v8  ;;  %v3086_v23 = vld [vmem:[#allocation4 + $0x10] sm:$0xff]   ;;  %v3078_v24 = vld [vmem:[#allocation2 + $0x28] sm:$0xff]   ;;  %v3087_v25 = vld [vmem:[#allocation4 + $0x18] sm:$0xff]  }
  0xfe   :  { %v3081_v26 = vld [vmem:[#allocation2 + $0x30] sm:$0xff]   ;;  %v3088_v27 = vld [vmem:[#allocation4 + $0x20] sm:$0xff]   ;;  %v3082_v28 = vld [vmem:[#allocation2 + $0x38] sm:$0xff]  }
  0xff   :  { %2547 = vmatpush3.bf16.msra.mxu0 %v3062_v2  ;;  %v3089_v29 = vld [vmem:[#allocation4 + $0x28] sm:$0xff]   ;;  %v3090_v30 = vld [vmem:[#allocation4 + $0x30] sm:$0xff]   ;;  %v3091_v31 = vld [vmem:[#allocation4 + $0x38] sm:$0xff]  }
 0x100   :  { %2548 = vmatprep.subr.bf16.mxu0 %v3063_v3  ;;  %2579 = vmatpush3.bf16.msra.mxu1 %v3072_v8  ;;  %v3092_v32 = vld [vmem:[#allocation6] sm:$0xff]   ;;  %v3109_v34 = vld [vmem:[#allocation10 + $0x8] sm:$0xff]   ;;  %v3110_v35 = vld [vmem:[#allocation10 + $0x10] sm:$0xff]  }
 0x101   :  { %2580 = vmatprep.subr.bf16.mxu1 %v3075_v10  ;;  %v3108_v33 = vld [vmem:[#allocation10] sm:$0xff]   ;;  %v3111_v36 = vld [vmem:[#allocation10 + $0x18] sm:$0xff]   ;;  %v3113_v38 = vld [vmem:[#allocation10 + $0x28] sm:$0xff]  }
 0x102   :  { %v3112_v37 = vld [vmem:[#allocation10 + $0x20] sm:$0xff]   ;;  %v3114_v39 = vld [vmem:[#allocation10 + $0x30] sm:$0xff]  }
 0x103   :  { %2549 = vmatpush3.bf16.msra.mxu0 %v3063_v3  ;;  %v3820_v41 = vld [vmem:[%s4093_s7] ss:$0 sm:$0xff] }
 0x104   :  { %2550 = vmatprep.subr.bf16.mxu0 %v3064_v6  ;;  %2581 = vmatpush3.bf16.msra.mxu1 %v3075_v10  ;;  %v3833_v51 = vld [vmem:[%s4095_s9] ss:$0 sm:$0xff] }
 0x105   :  { %2582 = vmatprep.subr.bf16.mxu1 %v3076_v12 }
 0x107   :  { %2551 = vmatpush3.bf16.msra.mxu0 %v3064_v6 }
 0x108   :  { %2552 = vmatprep.subr.bf16.mxu0 %v3065_v9  ;;  %2583 = vmatpush3.bf16.msra.mxu1 %v3076_v12 }
 0x109   :  { %2584 = vmatprep.subr.bf16.mxu1 %v3079_v14 }
 0x10b   :  { %2553 = vmatpush3.bf16.msra.mxu0 %v3065_v9 }
 0x10c   :  { %2554 = vmatprep.subr.bf16.mxu0 %v3066_v11  ;;  %2585 = vmatpush3.bf16.msra.mxu1 %v3079_v14 }
 0x10d   :  { %2586 = vmatprep.subr.bf16.mxu1 %v3080_v16 }
 0x10f   :  { %2555 = vmatpush3.bf16.msra.mxu0 %v3066_v11 }
 0x110   :  { %2556 = vmatprep.subr.bf16.mxu0 %v3067_v13  ;;  %2587 = vmatpush3.bf16.msra.mxu1 %v3080_v16 }
 0x111   :  { %2588 = vmatprep.subr.bf16.mxu1 %v3083_v19 }
 0x113   :  { %2557 = vmatpush3.bf16.msra.mxu0 %v3067_v13 }
 0x114   :  { %2589 = vmatpush3.bf16.msra.mxu1 %v3083_v19 }
 0x115   :  { %2638 = vmatprep.subr.bf16.mxu1 %v3108_v33 }
 0x116   :  { %2559 = vmatmul.mubr.bf16.vlgmr.msra.gmra.mrb[0].mxu0 %v3070_v17 }
 0x117   :  { %2562 = vmatprep.mubr.bf16.mxu0 %v3073_v18  ;;  %2591 = vmatmul.mubr.bf16.vlgmr.msra.gmra.mrb[0].mxu1 %v3085_v21 }
 0x118   :  { %2594 = vmatprep.mubr.bf16.mxu1 %v3086_v23  ;;  %2639 = vmatpush3.bf16.msra.mxu1 %v3108_v33 }
 0x119   :  { %2640 = vmatprep.subr.bf16.mxu1 %v3109_v34 }
 0x11c   :  { %2641 = vmatpush3.bf16.msra.mxu1 %v3109_v34 }
 0x11d   :  { %2642 = vmatprep.subr.bf16.mxu1 %v3110_v35 }
 0x11e   :  { %2563 = vmatmul.mubr.bf16.gmra.mrb[4].mxu0 %v3074_v20 }
 0x11f   :  { %2566 = vmatprep.mubr.bf16.mxu0 %v3077_v22  ;;  %2595 = vmatmul.mubr.bf16.gmra.mrb[4].mxu1 %v3087_v25 }
 0x120   :  { %2598 = vmatprep.mubr.bf16.mxu1 %v3088_v27  ;;  %2643 = vmatpush3.bf16.msra.mxu1 %v3110_v35 }
 0x121   :  { %2644 = vmatprep.subr.bf16.mxu1 %v3111_v36 }
 0x124   :  { %2645 = vmatpush3.bf16.msra.mxu1 %v3111_v36 }
 0x125   :  { %2646 = vmatprep.subr.bf16.mxu1 %v3112_v37 }
 0x126   :  { %2567 = vmatmul.mubr.bf16.gmra.mrb[8].mxu0 %v3078_v24 }
 0x127   :  { %2570 = vmatprep.mubr.bf16.mxu0 %v3081_v26  ;;  %2599 = vmatmul.mubr.bf16.gmra.mrb[8].mxu1 %v3089_v29 }
 0x128   :  { %2602 = vmatprep.mubr.bf16.mxu1 %v3090_v30  ;;  %2647 = vmatpush3.bf16.msra.mxu1 %v3112_v37 }
 0x129   :  { %2648 = vmatprep.subr.bf16.mxu1 %v3113_v38 }
 0x12c   :  { %2649 = vmatpush3.bf16.msra.mxu1 %v3113_v38 }
 0x12d   :  { %2650 = vmatprep.subr.bf16.mxu1 %v3114_v39 }
 0x12e   :  { %2571 = vmatmul.mubr.bf16.gmra.mrb[12].mxu0 %v3082_v28 }
 0x12f   :  { %2603 = vmatmul.mubr.bf16.gmra.mrb[12].mxu1 %v3091_v31  ;;  %2622 = vmatprep.mubr.bf16.mxu0 %v3092_v32 }
 0x130   :  { %2651 = vmatpush3.bf16.msra.mxu1 %v3114_v39 }
 0x1e9   :  { %v2560_v40 = vpop.f32.mrb[0].mxu0 }
 0x1ea   :  { %v401_v42 = vpop.f32.mrb[1].mxu0  ;;  %v410_v44 = vadd.f32 %v2560_v40, %v3820_v41  ;;  %v2592_v53 = vpop.f32.mrb[0].mxu1 }
 0x1eb   :  { %v2561_v43 = vpop.f32.mrb[2].mxu0  ;;  %v402_v47 = vadd.f32 %v3820_v41, %v401_v42  ;;  %v642_v55 = vadd.f32 %v2592_v53, %v3833_v51  ;;  %v633_v56 = vpop.f32.mrb[1].mxu1 }
 0x1ec   :  { %v413_v45 = vadd.f32 %v2561_v43, %v3820_v41  ;;  %v404_v46 = vpop.f32.mrb[3].mxu0  ;;  %v634_v58 = vadd.f32 %v3833_v51, %v633_v56  ;;  %v2593_v59 = vpop.f32.mrb[2].mxu1 }
 0x1ed   :  { %v405_v48 = vadd.f32 %v3820_v41, %v404_v46  ;;  %v645_v63 = vadd.f32 %v2593_v59, %v3833_v51  ;;  %v636_v0 = vpop.f32.mrb[3].mxu1 }
 0x1ee   :  { %v3826_v49 = vpack.c.bf16 %v413_v45, %v410_v44  ;;  %v637_v3 = vadd.f32 %v3833_v51, %v636_v0  ;;  %v3096_v0 = vld [vmem:[#allocation6 + $0x20] sm:$0xff]  }
 0x1ef   :  { %v3828_v50 = vpack.c.bf16 %v405_v48, %v402_v47  ;;  %v3849_v5 = vpack.c.bf16 %v645_v63, %v642_v55  ;;  %v3095_v63 = vld [vmem:[#allocation6 + $0x18] sm:$0xff]  }
 0x1f0   :  { %v3853_v7 = vpack.c.bf16 %v637_v3, %v634_v58  ;;  %v3093_v58 = vld [vmem:[#allocation6 + $0x8] sm:$0xff]   ;;  %v3100_v3 = vld [vmem:[#allocation7] sm:$0xff]  }
 0x1f1   :  { %v2564_v52 = vpop.f32.mrb[4].mxu0  ;;  %2606 = vmatprep.subr.bf16.mxu0 %v3828_v50 }
 0x1f2   :  { %v417_v54 = vpop.f32.mrb[5].mxu0  ;;  %2607 = vmatpush3.bf16.msra.mxu0 %v3828_v50  ;;  %v426_v60 = vadd.f32 %v2564_v52, %v3820_v41  ;;  %v2596_v9 = vpop.f32.mrb[4].mxu1 }
 0x1f3   :  { %v2565_v57 = vpop.f32.mrb[6].mxu0  ;;  %2608 = vmatprep.subr.bf16.mxu0 %v3826_v49  ;;  %v418_v1 = vadd.f32 %v3820_v41, %v417_v54  ;;  %v658_v11 = vadd.f32 %v2596_v9, %v3833_v51  ;;  %v649_v12 = vpop.f32.mrb[5].mxu1  ;;  %v3102_v9 = vld [vmem:[#allocation7 + $0x10] sm:$0xff]  }
 0x1f4   :  { %v429_v61 = vadd.f32 %v2565_v57, %v3820_v41  ;;  %v420_v62 = vpop.f32.mrb[7].mxu0  ;;  %v650_v14 = vadd.f32 %v3833_v51, %v649_v12  ;;  %v2597_v15 = vpop.f32.mrb[6].mxu1  ;;  %v3105_v12 = vld [vmem:[#allocation7 + $0x28] sm:$0xff]  }
 0x1f5   :  { %v421_v2 = vadd.f32 %v3820_v41, %v420_v62  ;;  %v661_v19 = vadd.f32 %v2597_v15, %v3833_v51  ;;  %v652_v20 = vpop.f32.mrb[7].mxu1  ;;  %v3115_v15 = vld [vmem:[#allocation10 + $0x38] sm:$0xff]  }
 0x1f6   :  { %v3846_v4 = vpack.c.bf16 %v429_v61, %v426_v60  ;;  %2609 = vmatpush3.bf16.msra.mxu0 %v3826_v49  ;;  %v653_v23 = vadd.f32 %v3833_v51, %v652_v20  ;;  %v3094_v60 = vld [vmem:[#allocation6 + $0x10] sm:$0xff]   ;;  %2652 = vmatprep.subr.bf16.mxu1 %v3115_v15  ;;  %v3123_v20 = vld [vmem:[#allocation13 + $0x18] sm:$0xff]  }
 0x1f7   :  { %v3851_v6 = vpack.c.bf16 %v421_v2, %v418_v1  ;;  %v3869_v25 = vpack.c.bf16 %v661_v19, %v658_v11  ;;  %v3098_v1 = vld [vmem:[#allocation6 + $0x30] sm:$0xff]   ;;  %v3099_v2 = vld [vmem:[#allocation6 + $0x38] sm:$0xff]   ;;  %v3104_v11 = vld [vmem:[#allocation7 + $0x20] sm:$0xff]   ;;  %2653 = vmatpush3.bf16.msra.mxu1 %v3115_v15 }
 0x1f8   :  { %v3873_v27 = vpack.c.bf16 %v653_v23, %v650_v14  ;;  %v3107_v14 = vld [vmem:[#allocation7 + $0x38] sm:$0xff]   ;;  %v3121_v19 = vld [vmem:[#allocation13 + $0x10] sm:$0xff]  }
 0x1f9   :  { %v2568_v8 = vpop.f32.mrb[8].mxu0  ;;  %2610 = vmatprep.subr.bf16.mxu0 %v3851_v6  ;;  %v3129_v23 = vld [vmem:[#allocation13 + $0x30] sm:$0xff]  }
 0x1fa   :  { %v433_v10 = vpop.f32.mrb[9].mxu0  ;;  %2611 = vmatpush3.bf16.msra.mxu0 %v3851_v6  ;;  %v442_v16 = vadd.f32 %v2568_v8, %v3820_v41  ;;  %v2600_v29 = vpop.f32.mrb[8].mxu1  ;;  %v3101_v8 = vld [vmem:[#allocation7 + $0x8] sm:$0xff]  }
 0x1fb   :  { %v2569_v13 = vpop.f32.mrb[10].mxu0  ;;  %2612 = vmatprep.subr.bf16.mxu0 %v3846_v4  ;;  %v434_v21 = vadd.f32 %v3820_v41, %v433_v10  ;;  %v674_v31 = vadd.f32 %v2600_v29, %v3833_v51  ;;  %v665_v32 = vpop.f32.mrb[9].mxu1  ;;  %v3103_v10 = vld [vmem:[#allocation7 + $0x18] sm:$0xff]   ;;  %v3923_v29 = vld [vmem:[#allocation15] sm:$0xff]  }
 0x1fc   :  { %v445_v17 = vadd.f32 %v2569_v13, %v3820_v41  ;;  %v436_v18 = vpop.f32.mrb[11].mxu0  ;;  %v666_v34 = vadd.f32 %v3833_v51, %v665_v32  ;;  %v2601_v35 = vpop.f32.mrb[10].mxu1  ;;  %v3106_v13 = vld [vmem:[#allocation7 + $0x30] sm:$0xff]   ;;  %v1749_v32 = vld [vmem:[%s4125_s26] sm:$0xff] }
 0x1fd   :  { %v437_v22 = vadd.f32 %v3820_v41, %v436_v18  ;;  %v677_v39 = vadd.f32 %v2601_v35, %v3833_v51  ;;  %v668_v40 = vpop.f32.mrb[11].mxu1  ;;  %v3119_v18 = vld [vmem:[#allocation13 + $0x8] sm:$0xff]  }
 0x1fe   :  { %v3866_v24 = vpack.c.bf16 %v445_v17, %v442_v16  ;;  %2613 = vmatpush3.bf16.msra.mxu0 %v3846_v4  ;;  %v669_v44 = vadd.f32 %v3833_v51, %v668_v40  ;;  %v3116_v16 = vld [vmem:[#allocation12] sm:$0xff]  }
 0x1ff   :  { %v3871_v26 = vpack.c.bf16 %v437_v22, %v434_v21  ;;  %v3889_v46 = vpack.c.bf16 %v677_v39, %v674_v31  ;;  %v3117_v17 = vld [vmem:[#allocation13] sm:$0xff]   ;;  %2670 = vmatprep.subr.bf16.mxu1 %v3116_v16  ;;  %v3127_v22 = vld [vmem:[#allocation13 + $0x28] sm:$0xff]   ;;  %v3456_v31 = vmov 0  }
 0x200   :  { %v3893_v48 = vpack.c.bf16 %v669_v44, %v666_v34  ;;  %v3125_v21 = vld [vmem:[#allocation13 + $0x20] sm:$0xff]   ;;  %3059 = vset.pattern.permute.xlu0 %v3456_v31  ;;  %v3118_v39 = vld [vmem:[#allocation12 + $0x8] sm:$0xff]  }
 0x201   :  { %v2572_v28 = vpop.f32.mrb[12].mxu0  ;;  %2614 = vmatprep.subr.bf16.mxu0 %v3871_v26 }
 0x202   :  { %v449_v30 = vpop.f32.mrb[13].mxu0  ;;  %2615 = vmatpush3.bf16.msra.mxu0 %v3871_v26  ;;  %v458_v36 = vadd.f32 %v2572_v28, %v3820_v41  ;;  %v2604_v52 = vpop.f32.mrb[12].mxu1  ;;  %v3131_v28 = vld [vmem:[#allocation13 + $0x38] sm:$0xff]  }
 0x203   :  { %v2573_v33 = vpop.f32.mrb[14].mxu0  ;;  %2616 = vmatprep.subr.bf16.mxu0 %v3866_v24  ;;  %v450_v42 = vadd.f32 %v3820_v41, %v449_v30  ;;  %v690_v53 = vadd.f32 %v2604_v52, %v3833_v51  ;;  %v1742_v30 = vld [vmem:[%s4124_s0] sm:$0xff] }
 0x204   :  { %v461_v37 = vadd.f32 %v2573_v33, %v3820_v41  ;;  %v452_v38 = vpop.f32.mrb[15].mxu0  ;;  %1744 = vperm.xlu0 %3059, %v1742_v30   ;;  %v3135_v30 = vld [vmem:[#allocation15 + $0x18] sm:$0xff]  }
 0x205   :  { %v453_v43 = vadd.f32 %v3820_v41, %v452_v38  ;;  %v681_v41 = vpop.f32.mrb[13].mxu1 }
 0x206   :  { %v3886_v45 = vpack.c.bf16 %v461_v37, %v458_v36  ;;  %2617 = vmatpush3.bf16.msra.mxu0 %v3866_v24  ;;  %v682_v54 = vadd.f32 %v3833_v51, %v681_v41  ;;  %v2605_v55 = vpop.f32.mrb[14].mxu1 }
 0x207   :  { %v3891_v47 = vpack.c.bf16 %v453_v43, %v450_v42  ;;  %v693_v56 = vadd.f32 %v2605_v55, %v3833_v51  ;;  %v684_v57 = vpop.f32.mrb[15].mxu1  ;;  %v3120_v43 = vld [vmem:[#allocation12 + $0x10] sm:$0xff]  }
 0x208   :  { %v685_v59 = vadd.f32 %v3833_v51, %v684_v57  ;;  %v3097_v51 = vld [vmem:[#allocation6 + $0x28] sm:$0xff]   ;;  %1751 = vperm.xlu0 %3059, %v1749_v32   ;;  %v3124_v57 = vld [vmem:[#allocation12 + $0x20] sm:$0xff]  }
 0x209   :  { %2618 = vmatprep.subr.bf16.mxu0 %v3891_v47  ;;  %v3903_v61 = vpack.c.bf16 %v693_v56, %v690_v53 }
 0x20a   :  { %2619 = vmatpush3.bf16.msra.mxu0 %v3891_v47  ;;  %v3906_v62 = vpack.c.bf16 %v685_v59, %v682_v54  ;;  %v3122_v54 = vld [vmem:[#allocation12 + $0x18] sm:$0xff]  }
 0x20b   :  { %2620 = vmatprep.subr.bf16.mxu0 %v3886_v45 }
 0x20e   :  { %2621 = vmatpush3.bf16.msra.mxu0 %v3886_v45 }
 0x20f   :  { %2702 = vmatprep.subr.bf16.mxu0 %v3853_v7 }
 0x211   :  { %2623 = vmatmul.mubr.bf16.vlgmr.msra.gmra.mrb[16].mxu0 %v3093_v58 }
 0x212   :  { %2703 = vmatpush3.bf16.msra.mxu0 %v3853_v7  ;;  %2626 = vmatprep.mubr.bf16.mxu0 %v3094_v60 }
 0x213   :  { %2704 = vmatprep.subr.bf16.mxu0 %v3849_v5 }
 0x216   :  { %2705 = vmatpush3.bf16.msra.mxu0 %v3849_v5 }
 0x217   :  { %2706 = vmatprep.subr.bf16.mxu0 %v3873_v27 }
 0x219   :  { %2627 = vmatmul.mubr.bf16.gmra.mrb[20].mxu0 %v3095_v63 }
 0x21a   :  { %2707 = vmatpush3.bf16.msra.mxu0 %v3873_v27  ;;  %2630 = vmatprep.mubr.bf16.mxu0 %v3096_v0  ;;  %v3126_v0 = vld [vmem:[#allocation12 + $0x28] sm:$0xff]  }
 0x21b   :  { %2708 = vmatprep.subr.bf16.mxu0 %v3869_v25 }
 0x21e   :  { %2709 = vmatpush3.bf16.msra.mxu0 %v3869_v25 }
 0x21f   :  { %2710 = vmatprep.subr.bf16.mxu0 %v3893_v48 }
 0x221   :  { %2631 = vmatmul.mubr.bf16.gmra.mrb[24].mxu0 %v3097_v51 }
 0x222   :  { %2711 = vmatpush3.bf16.msra.mxu0 %v3893_v48  ;;  %2634 = vmatprep.mubr.bf16.mxu0 %v3098_v1 }
 0x223   :  { %2712 = vmatprep.subr.bf16.mxu0 %v3889_v46 }
 0x226   :  { %2713 = vmatpush3.bf16.msra.mxu0 %v3889_v46 }
 0x227   :  { %2714 = vmatprep.subr.bf16.mxu0 %v3906_v62 }
 0x229   :  { %2635 = vmatmul.mubr.bf16.gmra.mrb[28].mxu0 %v3099_v2  ;;  %v3128_v2 = vld [vmem:[#allocation12 + $0x30] sm:$0xff]  }
 0x22a   :  { %2715 = vmatpush3.bf16.msra.mxu0 %v3906_v62  ;;  %2718 = vmatprep.mubr.bf16.mxu0 %v3100_v3 }
 0x22b   :  { %2716 = vmatprep.subr.bf16.mxu0 %v3903_v61 }
 0x22e   :  { %2717 = vmatpush3.bf16.msra.mxu0 %v3903_v61 }
 0x22f   :  { %2734 = vmatprep.subr.bf16.mxu0 %v3117_v17 }
 0x231   :  { %2719 = vmatmul.mubr.bf16.vlgmr.msra.gmra.mrb[32].mxu0 %v3101_v8 }
 0x232   :  { %2722 = vmatprep.mubr.bf16.mxu0 %v3102_v9  ;;  %2735 = vmatpush3.bf16.msra.mxu0 %v3117_v17 }
 0x233   :  { %2736 = vmatprep.subr.bf16.mxu0 %v3119_v18 }
 0x236   :  { %2737 = vmatpush3.bf16.msra.mxu0 %v3119_v18  ;;  %v3133_v18 = vld [vmem:[#allocation15 + $0x8] sm:$0xff]  }
 0x237   :  { %2738 = vmatprep.subr.bf16.mxu0 %v3121_v19 }
 0x239   :  { %2723 = vmatmul.mubr.bf16.gmra.mrb[36].mxu0 %v3103_v10 }
 0x23a   :  { %2726 = vmatprep.mubr.bf16.mxu0 %v3104_v11  ;;  %2739 = vmatpush3.bf16.msra.mxu0 %v3121_v19  ;;  %v3130_v11 = vld [vmem:[#allocation12 + $0x38] sm:$0xff]  }
 0x23b   :  { %2740 = vmatprep.subr.bf16.mxu0 %v3123_v20 }
 0x23e   :  { %2741 = vmatpush3.bf16.msra.mxu0 %v3123_v20 }
 0x23f   :  { %2742 = vmatprep.subr.bf16.mxu0 %v3125_v21 }
 0x241   :  { %2727 = vmatmul.mubr.bf16.gmra.mrb[40].mxu0 %v3105_v12 }
 0x242   :  { %2730 = vmatprep.mubr.bf16.mxu0 %v3106_v13  ;;  %2743 = vmatpush3.bf16.msra.mxu0 %v3125_v21 }
 0x243   :  { %2744 = vmatprep.subr.bf16.mxu0 %v3127_v22 }
 0x246   :  { %2745 = vmatpush3.bf16.msra.mxu0 %v3127_v22 }
 0x247   :  { %2746 = vmatprep.subr.bf16.mxu0 %v3129_v23 }
 0x249   :  { %2731 = vmatmul.mubr.bf16.gmra.mrb[44].mxu0 %v3107_v14 }
 0x24a   :  { %2747 = vmatpush3.bf16.msra.mxu0 %v3129_v23 }
 0x24b   :  { %2748 = vmatprep.subr.bf16.mxu0 %v3131_v28 }
 0x24e   :  { %2749 = vmatpush3.bf16.msra.mxu0 %v3131_v28 }
 0x24f   :  { %2766 = vmatprep.subr.bf16.mxu0 %v3923_v29 }
 0x2e4   :  { %v2624_v33 = vpop.f32.mrb[16].mxu0 }
 0x2e5   :  { %v810_v34 = vpop.f32.mrb[17].mxu0 }
 0x2e6   :  { %v2625_v35 = vpop.f32.mrb[18].mxu0 }
 0x2e7   :  { %v874_v36 = vpack.c.bf16 %v2625_v35, %v2624_v33  ;;  %v813_v37 = vpop.f32.mrb[19].mxu0  ;;  %v3137_v35 = vld [vmem:[#allocation15 + $0x28] sm:$0xff]  }
 0x2e8   :  { %v873_v38 = vpack.c.bf16 %v813_v37, %v810_v34 }
 0x2ea   :  { %2654 = vmatprep.mubr.bf16.mxu1 %v873_v38 }
 0x2eb   :  { %2655 = vmatmul.mubr.bf16.vlgmr.msra.gmra.mrb[16].mxu1 %v874_v36  ;;  %v3138_v36 = vld [vmem:[#allocation15 + $0x30] sm:$0xff]  }
 0x2ec   :  { %v2628_v40 = vpop.f32.mrb[20].mxu0  ;;  %2671 = vmatpush3.bf16.msra.mxu1 %v3116_v16 }
 0x2ed   :  { %v826_v42 = vpop.f32.mrb[21].mxu0  ;;  %2672 = vmatprep.subr.bf16.mxu1 %v3118_v39 }
 0x2ee   :  { %v2629_v44 = vpop.f32.mrb[22].mxu0 }
 0x2ef   :  { %v876_v52 = vpack.c.bf16 %v2629_v44, %v2628_v40  ;;  %v829_v53 = vpop.f32.mrb[23].mxu0 }
 0x2f0   :  { %v875_v41 = vpack.c.bf16 %v829_v53, %v826_v42  ;;  %2673 = vmatpush3.bf16.msra.mxu1 %v3118_v39  ;;  %v3139_v42 = vld [vmem:[#allocation15 + $0x38] sm:$0xff]  }
 0x2f1   :  { %2674 = vmatprep.subr.bf16.mxu1 %v3120_v43 }
 0x2f2   :  { %2658 = vmatprep.mubr.bf16.mxu1 %v875_v41 }
 0x2f3   :  { %2659 = vmatmul.mubr.bf16.gmra.mrb[20].mxu1 %v876_v52 }
 0x2f4   :  { %v2632_v55 = vpop.f32.mrb[24].mxu0  ;;  %2675 = vmatpush3.bf16.msra.mxu1 %v3120_v43 }
 0x2f5   :  { %v842_v56 = vpop.f32.mrb[25].mxu0  ;;  %2676 = vmatprep.subr.bf16.mxu1 %v3122_v54 }
 0x2f6   :  { %v2633_v58 = vpop.f32.mrb[26].mxu0 }
 0x2f7   :  { %v878_v59 = vpack.c.bf16 %v2633_v58, %v2632_v55  ;;  %v845_v60 = vpop.f32.mrb[27].mxu0 }
 0x2f8   :  { %v877_v63 = vpack.c.bf16 %v845_v60, %v842_v56  ;;  %2677 = vmatpush3.bf16.msra.mxu1 %v3122_v54 }
 0x2f9   :  { %2678 = vmatprep.subr.bf16.mxu1 %v3124_v57 }
 0x2fa   :  { %2662 = vmatprep.mubr.bf16.mxu1 %v877_v63 }
 0x2fb   :  { %2663 = vmatmul.mubr.bf16.gmra.mrb[24].mxu1 %v878_v59 }
 0x2fc   :  { %v2636_v51 = vpop.f32.mrb[28].mxu0  ;;  %2679 = vmatpush3.bf16.msra.mxu1 %v3124_v57 }
 0x2fd   :  { %v858_v1 = vpop.f32.mrb[29].mxu0  ;;  %2680 = vmatprep.subr.bf16.mxu1 %v3126_v0 }
 0x2fe   :  { %v2637_v3 = vpop.f32.mrb[30].mxu0 }
 0x2ff   :  { %v880_v8 = vpack.c.bf16 %v2637_v3, %v2636_v51  ;;  %v861_v9 = vpop.f32.mrb[31].mxu0 }
 0x300   :  { %v879_v10 = vpack.c.bf16 %v861_v9, %v858_v1  ;;  %2681 = vmatpush3.bf16.msra.mxu1 %v3126_v0 }
 0x301   :  { %2682 = vmatprep.subr.bf16.mxu1 %v3128_v2 }
 0x302   :  { %2666 = vmatprep.mubr.bf16.mxu1 %v879_v10 }
 0x303   :  { %2667 = vmatmul.mubr.bf16.gmra.mrb[28].mxu1 %v880_v8 }
 0x304   :  { %2683 = vmatpush3.bf16.msra.mxu1 %v3128_v2  ;;  %2686 = vmatprep.mubr.bf16.mxu1 %v3853_v7  ;;  %v2720_v12 = vpop.f32.mrb[32].mxu0  ;;  %v3134_v7 = vld [vmem:[#allocation15 + $0x10] sm:$0xff]  }
 0x305   :  { %v1324_v13 = vpop.f32.mrb[33].mxu0  ;;  %2684 = vmatprep.subr.bf16.mxu1 %v3130_v11 }
 0x306   :  { %v2721_v14 = vpop.f32.mrb[34].mxu0 }
 0x307   :  { %v1388_v15 = vpack.c.bf16 %v2721_v14, %v2720_v12  ;;  %v1327_v16 = vpop.f32.mrb[35].mxu0 }
 0x308   :  { %v1387_v17 = vpack.c.bf16 %v1327_v16, %v1324_v13  ;;  %2685 = vmatpush3.bf16.msra.mxu1 %v3130_v11 }
 0x30a   :  { %2750 = vmatprep.mubr.bf16.mxu0 %v1387_v17 }
 0x30b   :  { %2687 = vmatmul.mubr.bf16.vlgmr.msra.gmra.mrb[16].mxu1 %v3849_v5  ;;  %2751 = vmatmul.mubr.bf16.vlgmr.msra.gmra.mrb[48].mxu0 %v1388_v15 }
 0x30c   :  { %2690 = vmatprep.mubr.bf16.mxu1 %v3873_v27  ;;  %v2724_v19 = vpop.f32.mrb[36].mxu0  ;;  %2767 = vmatpush3.bf16.msra.mxu0 %v3923_v29  ;;  %v3136_v29 = vld [vmem:[#allocation15 + $0x20] sm:$0xff]  }
 0x30d   :  { %v1340_v20 = vpop.f32.mrb[37].mxu0  ;;  %2768 = vmatprep.subr.bf16.mxu0 %v3133_v18 }
 0x30e   :  { %v2725_v21 = vpop.f32.mrb[38].mxu0 }
 0x30f   :  { %v1390_v22 = vpack.c.bf16 %v2725_v21, %v2724_v19  ;;  %v1343_v23 = vpop.f32.mrb[39].mxu0  ;;  %v2306_v21 = vld [vmem:[%s4100_s14] ss:$0 sm:$0xff] }
 0x310   :  { %v1389_v28 = vpack.c.bf16 %v1343_v23, %v1340_v20  ;;  %2769 = vmatpush3.bf16.msra.mxu0 %v3133_v18 }
 0x311   :  { %2770 = vmatprep.subr.bf16.mxu0 %v3134_v7 }
 0x312   :  { %2754 = vmatprep.mubr.bf16.mxu0 %v1389_v28 }
 0x313   :  { %2691 = vmatmul.mubr.bf16.gmra.mrb[20].mxu1 %v3869_v25  ;;  %2755 = vmatmul.mubr.bf16.gmra.mrb[52].mxu0 %v1390_v22 }
 0x314   :  { %2694 = vmatprep.mubr.bf16.mxu1 %v3893_v48  ;;  %v2728_v5 = vpop.f32.mrb[40].mxu0  ;;  %2771 = vmatpush3.bf16.msra.mxu0 %v3134_v7 }
 0x315   :  { %v1356_v27 = vpop.f32.mrb[41].mxu0  ;;  %2772 = vmatprep.subr.bf16.mxu0 %v3135_v30 }
 0x316   :  { %v2729_v31 = vpop.f32.mrb[42].mxu0 }
 0x317   :  { %v1392_v32 = vpack.c.bf16 %v2729_v31, %v2728_v5  ;;  %v1359_v33 = vpop.f32.mrb[43].mxu0 }
 0x318   :  { %v1391_v34 = vpack.c.bf16 %v1359_v33, %v1356_v27  ;;  %2773 = vmatpush3.bf16.msra.mxu0 %v3135_v30 }
 0x319   :  { %2774 = vmatprep.subr.bf16.mxu0 %v3136_v29 }
 0x31a   :  { %2758 = vmatprep.mubr.bf16.mxu0 %v1391_v34 }
 0x31b   :  { %2695 = vmatmul.mubr.bf16.gmra.mrb[24].mxu1 %v3889_v46  ;;  %2759 = vmatmul.mubr.bf16.gmra.mrb[56].mxu0 %v1392_v32  ;;  %v3457_v46 = vmov 0.0|0.0  }
 0x31c   :  { %2698 = vmatprep.mubr.bf16.mxu1 %v3906_v62  ;;  %v2732_v25 = vpop.f32.mrb[44].mxu0  ;;  %2775 = vmatpush3.bf16.msra.mxu0 %v3136_v29 }
 0x31d   :  { %v1372_v48 = vpop.f32.mrb[45].mxu0  ;;  %2776 = vmatprep.subr.bf16.mxu0 %v3137_v35  ;;  %2928 = vmatprep.subr.bf16.mxu1 %v3457_v46 }
 0x31e   :  { %v2733_v37 = vpop.f32.mrb[46].mxu0 }
 0x31f   :  { %v1394_v38 = vpack.c.bf16 %v2733_v37, %v2732_v25  ;;  %v1375_v39 = vpop.f32.mrb[47].mxu0 }
 0x320   :  { %v1393_v40 = vpack.c.bf16 %v1375_v39, %v1372_v48  ;;  %2777 = vmatpush3.bf16.msra.mxu0 %v3137_v35 }
 0x321   :  { %2778 = vmatprep.subr.bf16.mxu0 %v3138_v36 }
 0x322   :  { %2762 = vmatprep.mubr.bf16.mxu0 %v1393_v40 }
 0x323   :  { %2699 = vmatmul.mubr.bf16.gmra.mrb[28].mxu1 %v3903_v61  ;;  %2763 = vmatmul.mubr.bf16.gmra.mrb[60].mxu0 %v1394_v38 }
 0x324   :  { %2779 = vmatpush3.bf16.msra.mxu0 %v3138_v36  ;;  %2782 = vmatprep.mubr.bf16.mxu0 %v3828_v50  ;;  %v3459_v50 = vmov 0.0  }
 0x325   :  { %2780 = vmatprep.subr.bf16.mxu0 %v3139_v42  ;;  %2830 = vmatprep.mubr.msk.f32.mxu1 %vm3458_vm0, %v3459_v50 }
 0x328   :  { %2781 = vmatpush3.bf16.msra.mxu0 %v3139_v42 }
 0x329   :  { %2868 = vmatprep.subr.bf16.mxu0 %v3459_v50 }
 0x32b   :  { %2783 = vmatmul.mubr.bf16.vlgmr.msra.gmra.mrb[48].mxu0 %v3826_v49  ;;  %v2281_v49 = vld [vmem:[%s4097_s11] ss:$0 sm:$0xff] }
 0x32c   :  { %2786 = vmatprep.mubr.bf16.mxu0 %v3851_v6 }
 0x333   :  { %2787 = vmatmul.mubr.bf16.gmra.mrb[52].mxu0 %v3846_v4 }
 0x334   :  { %2790 = vmatprep.mubr.bf16.mxu0 %v3871_v26 }
 0x33b   :  { %2791 = vmatmul.mubr.bf16.gmra.mrb[56].mxu0 %v3866_v24 }
 0x33c   :  { %2794 = vmatprep.mubr.bf16.mxu0 %v3891_v47 }
 0x343   :  { %2795 = vmatmul.mubr.bf16.gmra.mrb[60].mxu0 %v3886_v45 }
 0x344   :  { %2884 = vmatprep.mubr.msk.bf16.mxu0 %vm3458_vm0, %v3459_v50 }
 0x3de   :  { %v2688_v4 = vpop.f32.mrb[16].mxu1 }
 0x3df   :  { %v1147_v6 = vpop.f32.mrb[17].mxu1  ;;  %v3958_v26 = vadd.f32 %v2688_v4, %v2281_v49 }
 0x3e0   :  { %v2689_v24 = vpop.f32.mrb[18].mxu1  ;;  %v3962_v61 = vadd.f32 %v2281_v49, %v1147_v6 }
 0x3e1   :  { %v3960_v45 = vadd.f32 %v2689_v24, %v2281_v49  ;;  %v1150_v47 = vpop.f32.mrb[19].mxu1 }
 0x3e2   :  { %v3964_v62 = vadd.f32 %v2281_v49, %v1150_v47 }
 0x3e3   :  { %v2956_v43 = vpack.c.bf16 %v3960_v45, %v3958_v26  ;;  %v3140_v45 = vld [vmem:[#allocation16] sm:$0xff]  }
 0x3e4   :  { %v2953_v44 = vpack.c.bf16 %v3964_v62, %v3962_v61  ;;  %v3141_v61 = vld [vmem:[#allocation16 + $0x8] sm:$0xff]   ;;  %v3142_v62 = vld [vmem:[#allocation16 + $0x10] sm:$0xff]  }
 0x3e6   :  { %v2692_v52 = vpop.f32.mrb[20].mxu1 }
 0x3e7   :  { %v1163_v53 = vpop.f32.mrb[21].mxu1  ;;  %v3970_v54 = vadd.f32 %v2692_v52, %v2281_v49 }
 0x3e8   :  { %v2693_v41 = vpop.f32.mrb[22].mxu1  ;;  %v3974_v57 = vadd.f32 %v2281_v49, %v1163_v53 }
 0x3e9   :  { %v3972_v55 = vadd.f32 %v2693_v41, %v2281_v49  ;;  %v1166_v56 = vpop.f32.mrb[23].mxu1 }
 0x3ea   :  { %v3976_v58 = vadd.f32 %v2281_v49, %v1166_v56 }
 0x3eb   :  { %v2962_v59 = vpack.c.bf16 %v3972_v55, %v3970_v54  ;;  %v3146_v54 = vld [vmem:[#allocation16 + $0x30] sm:$0xff]   ;;  %v3147_v55 = vld [vmem:[#allocation16 + $0x38] sm:$0xff]  }
 0x3ec   :  { %v2959_v60 = vpack.c.bf16 %v3976_v58, %v3974_v57  ;;  %v3148_v57 = vld [vmem:[#allocation18] sm:$0xff]   ;;  %v3149_v58 = vld [vmem:[#allocation18 + $0x8] sm:$0xff]  }
 0x3ed   :  { %2869 = vmatpush3.bf16.msra.mxu0 %v3148_v57 }
 0x3ee   :  { %v2696_v63 = vpop.f32.mrb[24].mxu1  ;;  %2870 = vmatprep.subr.bf16.mxu0 %v3459_v50 }
 0x3ef   :  { %v1179_v0 = vpop.f32.mrb[25].mxu1  ;;  %v3982_v1 = vadd.f32 %v2696_v63, %v2281_v49 }
 0x3f0   :  { %v2697_v51 = vpop.f32.mrb[26].mxu1  ;;  %v3986_v8 = vadd.f32 %v2281_v49, %v1179_v0 }
 0x3f1   :  { %v3984_v2 = vadd.f32 %v2697_v51, %v2281_v49  ;;  %v1182_v3 = vpop.f32.mrb[27].mxu1  ;;  %2871 = vmatpush3.bf16.msra.mxu0 %v3149_v58 }
 0x3f2   :  { %v3988_v9 = vadd.f32 %v2281_v49, %v1182_v3  ;;  %2872 = vmatprep.subr.bf16.mxu0 %v3459_v50 }
 0x3f3   :  { %v2968_v10 = vpack.c.bf16 %v3984_v2, %v3982_v1  ;;  %v3152_v1 = vld [vmem:[#allocation18 + $0x20] sm:$0xff]   ;;  %v3153_v2 = vld [vmem:[#allocation18 + $0x28] sm:$0xff]  }
 0x3f4   :  { %v2965_v11 = vpack.c.bf16 %v3988_v9, %v3986_v8  ;;  %v3154_v8 = vld [vmem:[#allocation18 + $0x30] sm:$0xff]   ;;  %v3155_v9 = vld [vmem:[#allocation18 + $0x38] sm:$0xff]  }
 0x3f6   :  { %v2700_v12 = vpop.f32.mrb[28].mxu1 }
 0x3f7   :  { %v1195_v13 = vpop.f32.mrb[29].mxu1  ;;  %v3994_v15 = vadd.f32 %v2700_v12, %v2281_v49 }
 0x3f8   :  { %v2701_v14 = vpop.f32.mrb[30].mxu1  ;;  %v3998_v18 = vadd.f32 %v2281_v49, %v1195_v13 }
 0x3f9   :  { %v3996_v16 = vadd.f32 %v2701_v14, %v2281_v49  ;;  %v1198_v17 = vpop.f32.mrb[31].mxu1 }
 0x3fa   :  { %v4000_v19 = vadd.f32 %v2281_v49, %v1198_v17 }
 0x3fb   :  { %v2974_v20 = vpack.c.bf16 %v3996_v16, %v3994_v15 }
 0x3fc   :  { %v2971_v7 = vpack.c.bf16 %v4000_v19, %v3998_v18 }
 0x3fe   :  { %v2784_v22 = vpop.f32.mrb[48].mxu0 }
 0x3ff   :  { %v1661_v23 = vpop.f32.mrb[49].mxu0  ;;  %v2992_v30 = vadd.f32 %v2784_v22, %v2306_v21 }
 0x400   :  { %v2785_v28 = vpop.f32.mrb[50].mxu0  ;;  %v2993_v29 = vadd.f32 %v2306_v21, %v1661_v23  ;;  %v1740_v23 = vlaneseq }
 0x401   :  { %v2994_v5 = vadd.f32 %v2785_v28, %v2306_v21  ;;  %v1664_v27 = vpop.f32.mrb[51].mxu0 }
 0x402   :  { %v2995_v31 = vadd.f32 %v2306_v21, %v1664_v27  ;;  %v1745_v27 = vpop.permute.xlu0 %1744 }
 0x403   :  { %v2932_v32 = vpack.c.bf16 %v2994_v5, %v2992_v30  ;;  %v1741_v5 = vand.u32 127, %v1740_v23 }
 0x404   :  { %v2929_v33 = vpack.c.bf16 %v2995_v31, %v2993_v29  ;;  %v3460_v29 = vmov 1.0   ;;  %v3159_v31 = vld [vmem:[#allocation19 + $0x18] sm:$0xff]  }
 0x405   :  { %vm1746_vm1 = vcmp.eq.s32.totalorder %v1741_v5, %v1745_v27 }
 0x406   :  { %v2788_v34 = vpop.f32.mrb[52].mxu0  ;;  %2930 = vmatpush3.bf16.msra.mxu1 %v2929_v33  ;;  %v1752_v26 = vpop.permute.xlu0 %1751  ;;  %v3161_v33 = vld [vmem:[#allocation19 + $0x28] sm:$0xff]  }
 0x407   :  { %v1677_v35 = vpop.f32.mrb[53].mxu0  ;;  %2931 = vmatprep.subr.bf16.mxu1 %v3457_v46  ;;  %v2996_v48 = vadd.f32 %v2788_v34, %v2306_v21  ;;  %vm1753_vm2 = vcmp.eq.s32.totalorder %v1741_v5, %v1752_v26  ;;  %v3162_v34 = vld [vmem:[#allocation19 + $0x30] sm:$0xff]  }
 0x408   :  { %v2789_v25 = vpop.f32.mrb[54].mxu0  ;;  %v2997_v38 = vadd.f32 %v2306_v21, %v1677_v35  ;;  %v3163_v35 = vld [vmem:[#allocation19 + $0x38] sm:$0xff]  }
 0x409   :  { %v2998_v36 = vadd.f32 %v2789_v25, %v2306_v21  ;;  %v1680_v37 = vpop.f32.mrb[55].mxu0 }
 0x40a   :  { %v2999_v39 = vadd.f32 %v2306_v21, %v1680_v37  ;;  %2933 = vmatpush3.bf16.msra.mxu1 %v2932_v32  ;;  %v3160_v32 = vld [vmem:[#allocation19 + $0x20] sm:$0xff]  }
 0x40b   :  { %v2938_v40 = vpack.c.bf16 %v2998_v36, %v2996_v48  ;;  %2934 = vmatprep.subr.bf16.mxu1 %v3457_v46 }
 0x40c   :  { %v2935_v42 = vpack.c.bf16 %v2999_v39, %v2997_v38  ;;  %v2343_v39 = vld [vmem:[%s4104_s18] ss:$0 sm:$0xff] }
 0x40e   :  { %v2792_v49 = vpop.f32.mrb[56].mxu0  ;;  %2936 = vmatpush3.bf16.msra.mxu1 %v2935_v42 }
 0x40f   :  { %v1693_v4 = vpop.f32.mrb[57].mxu0  ;;  %2937 = vmatprep.subr.bf16.mxu1 %v3457_v46  ;;  %v3000_v24 = vadd.f32 %v2792_v49, %v2306_v21 }
 0x410   :  { %v2793_v6 = vpop.f32.mrb[58].mxu0  ;;  %v3001_v53 = vadd.f32 %v2306_v21, %v1693_v4 }
 0x411   :  { %v3002_v47 = vadd.f32 %v2793_v6, %v2306_v21  ;;  %v1696_v52 = vpop.f32.mrb[59].mxu0 }
 0x412   :  { %v3003_v41 = vadd.f32 %v2306_v21, %v1696_v52  ;;  %2939 = vmatpush3.bf16.msra.mxu1 %v2938_v40 }
 0x413   :  { %v2944_v56 = vpack.c.bf16 %v3002_v47, %v3000_v24  ;;  %2940 = vmatprep.subr.bf16.mxu1 %v3457_v46 }
 0x414   :  { %v2941_v63 = vpack.c.bf16 %v3003_v41, %v3001_v53 }
 0x416   :  { %v2796_v0 = vpop.f32.mrb[60].mxu0  ;;  %2942 = vmatpush3.bf16.msra.mxu1 %v2941_v63 }
 0x417   :  { %v1709_v51 = vpop.f32.mrb[61].mxu0  ;;  %2943 = vmatprep.subr.bf16.mxu1 %v3457_v46  ;;  %v3004_v12 = vadd.f32 %v2796_v0, %v2306_v21 }
 0x418   :  { %v2797_v3 = vpop.f32.mrb[62].mxu0  ;;  %v3005_v17 = vadd.f32 %v2306_v21, %v1709_v51 }
 0x419   :  { %v3006_v13 = vadd.f32 %v2797_v3, %v2306_v21  ;;  %v1712_v14 = vpop.f32.mrb[63].mxu0 }
 0x41a   :  { %v3007_v22 = vadd.f32 %v2306_v21, %v1712_v14  ;;  %2945 = vmatpush3.bf16.msra.mxu1 %v2944_v56  ;;  %v3158_v21 = vld [vmem:[#allocation19 + $0x10] sm:$0xff]  }
 0x41b   :  { %v2950_v28 = vpack.c.bf16 %v3006_v13, %v3004_v12  ;;  %2946 = vmatprep.subr.bf16.mxu1 %v3457_v46 }
 0x41c   :  { %v2947_v30 = vpack.c.bf16 %v3007_v22, %v3005_v17 }
 0x41e   :  { %2948 = vmatpush3.bf16.msra.mxu1 %v2947_v30 }
 0x41f   :  { %2949 = vmatprep.subr.bf16.mxu1 %v3457_v46 }
 0x422   :  { %2951 = vmatpush3.bf16.msra.mxu1 %v2950_v28 }
 0x423   :  { %2952 = vmatprep.subr.bf16.mxu1 %v3457_v46 }
 0x425   :  { %2831 = vmatmul.mubr.msk.f32.vlgmr.msra.gmra.mrb[32].mxu1 %vm1746_vm1, %v3460_v29 }
 0x426   :  { %2954 = vmatpush3.bf16.msra.mxu1 %v2953_v44  ;;  %2865 = vmatprep.mubr.msk.f32.mxu1 %vm3458_vm0, %v3459_v50  ;;  %v3145_v44 = vld [vmem:[#allocation16 + $0x28] sm:$0xff]  }
 0x427   :  { %2955 = vmatprep.subr.bf16.mxu1 %v3457_v46 }
 0x42a   :  { %2957 = vmatpush3.bf16.msra.mxu1 %v2956_v43  ;;  %v3144_v43 = vld [vmem:[#allocation16 + $0x20] sm:$0xff]  }
 0x42b   :  { %2958 = vmatprep.subr.bf16.mxu1 %v3457_v46 }
 0x42e   :  { %2960 = vmatpush3.bf16.msra.mxu1 %v2959_v60  ;;  %v3151_v60 = vld [vmem:[#allocation18 + $0x18] sm:$0xff]  }
 0x42f   :  { %2961 = vmatprep.subr.bf16.mxu1 %v3457_v46 }
 0x432   :  { %2963 = vmatpush3.bf16.msra.mxu1 %v2962_v59  ;;  %v3150_v59 = vld [vmem:[#allocation18 + $0x10] sm:$0xff]  }
 0x433   :  { %2964 = vmatprep.subr.bf16.mxu1 %v3457_v46  ;;  %2873 = vmatpush3.bf16.msra.mxu0 %v3150_v59 }
 0x434   :  { %2874 = vmatprep.subr.bf16.mxu0 %v3459_v50 }
 0x436   :  { %2966 = vmatpush3.bf16.msra.mxu1 %v2965_v11 }
 0x437   :  { %2967 = vmatprep.subr.bf16.mxu1 %v3457_v46  ;;  %2875 = vmatpush3.bf16.msra.mxu0 %v3151_v60 }
 0x438   :  { %2876 = vmatprep.subr.bf16.mxu0 %v3459_v50 }
 0x43a   :  { %2969 = vmatpush3.bf16.msra.mxu1 %v2968_v10 }
 0x43b   :  { %2970 = vmatprep.subr.bf16.mxu1 %v3457_v46  ;;  %2877 = vmatpush3.bf16.msra.mxu0 %v3152_v1 }
 0x43c   :  { %2878 = vmatprep.subr.bf16.mxu0 %v3459_v50 }
 0x43e   :  { %2972 = vmatpush3.bf16.msra.mxu1 %v2971_v7  ;;  %v3157_v7 = vld [vmem:[#allocation19 + $0x8] sm:$0xff]  }
 0x43f   :  { %2973 = vmatprep.subr.bf16.mxu1 %v3457_v46  ;;  %v3143_v46 = vld [vmem:[#allocation16 + $0x18] sm:$0xff]   ;;  %2879 = vmatpush3.bf16.msra.mxu0 %v3153_v2 }
 0x440   :  { %2880 = vmatprep.subr.bf16.mxu0 %v3459_v50 }
 0x442   :  { %2975 = vmatpush3.bf16.msra.mxu1 %v2974_v20  ;;  %v3156_v20 = vld [vmem:[#allocation19] sm:$0xff]  }
 0x443   :  { %2888 = vmatprep.subr.bf16.mxu1 %v3459_v50  ;;  %2881 = vmatpush3.bf16.msra.mxu0 %v3154_v8 }
 0x444   :  { %2882 = vmatprep.subr.bf16.mxu0 %v3459_v50 }
 0x445   :  { %2866 = vmatmul.mubr.msk.f32.vlgmr.msra.gmra.mrb[34].mxu1 %vm1753_vm2, %v3460_v29 }
 0x446   :  { %2889 = vmatpush3.bf16.msra.mxu1 %v3140_v45  ;;  %2904 = vmatprep.mubr.msk.bf16.mxu1 %vm3458_vm0, %v3459_v50 }
 0x447   :  { %2890 = vmatprep.subr.bf16.mxu1 %v3459_v50  ;;  %2883 = vmatpush3.bf16.msra.mxu0 %v3155_v9 }
 0x448   :  { %2908 = vmatprep.subr.bf16.mxu0 %v3459_v50 }
 0x44a   :  { %2891 = vmatpush3.bf16.msra.mxu1 %v3141_v61 }
 0x44b   :  { %2892 = vmatprep.subr.bf16.mxu1 %v3459_v50 }
 0x44e   :  { %2893 = vmatpush3.bf16.msra.mxu1 %v3142_v62 }
 0x44f   :  { %2894 = vmatprep.subr.bf16.mxu1 %v3459_v50 }
 0x452   :  { %2895 = vmatpush3.bf16.msra.mxu1 %v3143_v46 }
 0x453   :  { %2896 = vmatprep.subr.bf16.mxu1 %v3459_v50 }
 0x456   :  { %2897 = vmatpush3.bf16.msra.mxu1 %v3144_v43 }
 0x457   :  { %2898 = vmatprep.subr.bf16.mxu1 %v3459_v50 }
 0x45a   :  { %2899 = vmatpush3.bf16.msra.mxu1 %v3145_v44 }
 0x45b   :  { %2900 = vmatprep.subr.bf16.mxu1 %v3459_v50 }
 0x45e   :  { %2901 = vmatpush3.bf16.msra.mxu1 %v3146_v54 }
 0x45f   :  { %2902 = vmatprep.subr.bf16.mxu1 %v3459_v50 }
 0x462   :  { %2903 = vmatpush3.bf16.msra.mxu1 %v3147_v55 }
 0x4f8   :  { %v1822_v10 = vpop.f32.mrb[32].mxu1 }
 0x4f9   :  { %v1896_v11 = vpack.c.bf16 %v1822_v10, %v1822_v10  ;;  %v2832_v15 = vpop.f32.mrb[33].mxu1 }
 0x4fb   :  { %2905 = vmatmul.mubr.bf16.vlgmr.msra.gmra.mrb[36].mxu1 %v1896_v11 }
 0x518   :  { %v1892_v16 = vpop.f32.mrb[34].mxu1 }
 0x519   :  { %v1913_v18 = vpack.c.bf16 %v1892_v16, %v1892_v16  ;;  %v2867_v19 = vpop.f32.mrb[35].mxu1 }
 0x51b   :  { %2885 = vmatmul.mubr.bf16.vlgmr.msra.gmra.mrb[64].mxu0 %v1913_v18 }
 0x51c   :  { %2924 = vmatprep.mubr.msk.bf16.mxu0 %vm3458_vm0, %v3459_v50  ;;  %2909 = vmatpush3.bf16.msra.mxu0 %v3156_v20 }
 0x51d   :  { %2910 = vmatprep.subr.bf16.mxu0 %v3459_v50 }
 0x520   :  { %2911 = vmatpush3.bf16.msra.mxu0 %v3157_v7 }
 0x521   :  { %2912 = vmatprep.subr.bf16.mxu0 %v3459_v50 }
 0x524   :  { %2913 = vmatpush3.bf16.msra.mxu0 %v3158_v21 }
 0x525   :  { %2914 = vmatprep.subr.bf16.mxu0 %v3459_v50 }
 0x528   :  { %2915 = vmatpush3.bf16.msra.mxu0 %v3159_v31 }
 0x529   :  { %2916 = vmatprep.subr.bf16.mxu0 %v3459_v50 }
 0x52c   :  { %2917 = vmatpush3.bf16.msra.mxu0 %v3160_v32 }
 0x52d   :  { %2918 = vmatprep.subr.bf16.mxu0 %v3459_v50 }
 0x530   :  { %2919 = vmatpush3.bf16.msra.mxu0 %v3161_v33 }
 0x531   :  { %2920 = vmatprep.subr.bf16.mxu0 %v3459_v50 }
 0x534   :  { %2921 = vmatpush3.bf16.msra.mxu0 %v3162_v34 }
 0x535   :  { %2922 = vmatprep.subr.bf16.mxu0 %v3459_v50  ;;  %v2344_v50 = vld [vmem:[%s4126_s16] ss:$0 sm:$0xff] }
 0x538   :  { %2923 = vmatpush3.bf16.msra.mxu0 %v3163_v35 }
 0x5ce   :  { %v2100_v25 = vpop.f32.mrb[36].mxu1 }
 0x5cf   :  { %v2906_v48 = vpop.f32.mrb[37].mxu1 }
 0x5d0   :  { %v2103_v36 = vpop.f32.mrb[38].mxu1 }
 0x5d1   :  { %v2907_v37 = vpop.f32.mrb[39].mxu1 }
 0x5ee   :  { %v2012_v38 = vpop.f32.mrb[64].mxu0 }
 0x5ef   :  { %v2101_v40 = vadd.f32 %v2100_v25, %v2012_v38  ;;  %v2886_v42 = vpop.f32.mrb[65].mxu0 }
 0x5f0   :  { %v2015_v49 = vpop.f32.mrb[66].mxu0 }
 0x5f1   :  { %v2113_v4 = vadd.f32 %v2343_v39, %v2101_v40  ;;  %v2887_v6 = vpop.f32.mrb[67].mxu0 }
 0x5f3   :  { %v2114_v24 = vmax.f32 %v2113_v4, 0.0 }
 0x5f5   :  { %v2115_v47 = vpack.c.bf16 %v2114_v24, %v2114_v24 }
 0x5f7   :  { %2925 = vmatmul.mubr.bf16.vlgmr.msra.gmra.mrb[68].mxu0 %v2115_v47 }
 0x6ca   :  { %v2221_v52 = vpop.f32.mrb[68].mxu0 }
 0x6cb   :  { %v2222_v53 = vadd.f32 %v2344_v50, %v2221_v52  ;;  %v2926_v41 = vpop.f32.mrb[69].mxu0 }
 0x6cc   :  { %v2224_v56 = vpop.f32.mrb[70].mxu0 }
 0x6cd   :  { %2227 = vst [vmem:[%s4127_s6] sm:$0xff] %v2222_v53  ;;  %v2927_v63 = vpop.f32.mrb[71].mxu0 }
 0x6ce   :  { %2232 = vsyncpa [#allocation3], 1 }
 0x6cf   :  { %2233 = vsyncpa [#allocation5], 1 }
 0x6d0   :  { %2234 = vsyncpa [#allocation8], 1 }
 0x6d1   :  { %2235 = vsyncpa [#allocation11], 1 }
 0x6d2   :  { %2236 = vsyncpa [#allocation14], 1 }
 0x6d3   :  { %2237 = vsyncpa [#allocation17], 1 }
 0x6d4   :  { %2238 = vsyncpa [#allocation20], 1 }

</bundles_post_ra>
